<compile_context>
chip_gen: v5e
topology: v5e:2x2
jax: 0.10.0
libtpu: 0.0.40
codegen_flags: <defaults>
</compile_context>

<pallas_src>
import math

import jax
import jax.numpy as jnp
from jax.experimental import pallas as pl
from jax.experimental.pallas import tpu as pltpu


def _round_up(n: int, m: int) -> int:
    return ((n + m - 1) // m) * m


def _sin_pos_emb_kernel(x_ref, tab_ref, out_ref):
    """x_ref: (TB, 1) f32, tab_ref: (2, dim) f32 [freq_full; phase],
    out_ref: (TB, dim)."""
    x = x_ref[...]                      # (TB, 1) f32
    freq = tab_ref[0:1, :]              # (1, dim)
    phase = tab_ref[1:2, :]             # (1, dim)
    # Single fused, lane-dense transcendental + full-width store:
    #   sin(theta)            for the first half (phase = 0)
    #   sin(theta + pi/2)=cos for the second half (phase = pi/2)
    out_ref[...] = jnp.sin(x * freq + phase).astype(out_ref.dtype)


def _choose_tile(b: int, dim: int, block_rows: int, row_align: int,
                 out_itemsize: int) -> tuple[int, int]:
    """Pick (tb, b_pad): balanced row tiles, aligned, VMEM-budgeted."""
    b_al = _round_up(b, row_align)

    # VMEM budget: double-buffered output tile + double-buffered lane-padded
    # (tb, 128) f32 x tile; keep headroom under the 32 MiB scoped default.
    bytes_per_row = 2 * (dim * out_itemsize + 128 * 4)
    vmem_budget = 24 << 20
    max_rows = max(row_align, (vmem_budget // bytes_per_row) // row_align * row_align)
    block_rows = max(row_align, (block_rows // row_align) * row_align)
    block_rows = min(block_rows, max_rows)

    if b_al <= block_rows:
        return b_al, b_al                      # single grid step

    n_steps = pl.cdiv(b_al, block_rows)
    tb = _round_up(pl.cdiv(b_al, n_steps), row_align)   # balanced tiles
    b_pad = _round_up(b_al, tb)                # == b_al (== b) when b aligned
    return tb, b_pad


def sinusoidal_pos_emb(x: jax.Array, dim: int, *,
                       out_dtype=jnp.float32,
                       block_rows: int = 1024) -> jax.Array:
    """x: (B,) float timesteps -> (B, dim) embedding (sin | cos halves)."""
    assert dim % 2 == 0 and dim >= 4, dim
    half_dim = dim // 2
    b = x.shape[0]
    out_itemsize = jnp.dtype(out_dtype).itemsize
    row_align = 8 if out_itemsize >= 4 else 16   # sublane packing for bf16/fp8

    # Frequency / phase table computed once in the wrapper (hoisted out of the
    # per-tile body). Row 0: [freq, freq]; row 1: [0, ..., 0, pi/2, ..., pi/2].
    scale = -math.log(10000.0) / (half_dim - 1)
    freq_half = jnp.exp(jnp.arange(half_dim, dtype=jnp.float32) * scale)
    freq_full = jnp.concatenate([freq_half, freq_half])
    phase = jnp.concatenate([
        jnp.zeros((half_dim,), jnp.float32),
        jnp.full((half_dim,), math.pi / 2, dtype=jnp.float32),
    ])
    table = jnp.stack([freq_full, phase])        # (2, dim) f32

    tb, b_pad = _choose_tile(b, dim, block_rows, row_align, out_itemsize)

    x2d = x.reshape(b, 1).astype(jnp.float32)
    if b_pad != b:
        x2d = jnp.pad(x2d, ((0, b_pad - b), (0, 0)))

    out = pl.pallas_call(
        _sin_pos_emb_kernel,
        out_shape=jax.ShapeDtypeStruct((b_pad, dim), out_dtype),
        grid=(b_pad // tb,),
        in_specs=[
            pl.BlockSpec((tb, 1), lambda i: (i, 0)),       # batch tile of x
            pl.BlockSpec((2, dim), lambda i: (0, 0)),      # resident freq/phase
        ],
        out_specs=pl.BlockSpec((tb, dim), lambda i: (i, 0)),
        compiler_params=pltpu.CompilerParams(
            dimension_semantics=("parallel",),             # megacore on v7x
        ),
    )(x2d, table)

    # Only sliced on the (rare) padded path; common aligned cases avoid the
    # extra output read+write entirely.
    return out[:b] if b_pad != b else out


def _reference(x, dim):
    half_dim = dim // 2
    emb = math.log(10000.0) / (half_dim - 1)
    emb = jnp.exp(jnp.arange(half_dim, dtype=jnp.float32) * -emb)
    emb = x[:, None].astype(jnp.float32) * emb[None, :]
    return jnp.concatenate([jnp.sin(emb), jnp.cos(emb)], axis=-1)


if __name__ == "__main__":
    key = jax.random.PRNGKey(0)

    # Case 1: lane-dense dim (multiple of 128), batch a multiple of 8
    # (single grid step, no padding, no output slice).
    b1, d1 = 64, 128
    x1 = jax.random.uniform(key, (b1,), minval=0.0, maxval=100.0,
                            dtype=jnp.float32)
    out1 = jax.block_until_ready(sinusoidal_pos_emb(x1, d1))
    ref1 = _reference(x1, d1)
    assert out1.shape == (b1, d1), out1.shape
    assert jnp.allclose(out1, ref1, atol=1e-4, rtol=1e-4), (
        float(jnp.max(jnp.abs(out1 - ref1)))
    )

    # Case 2: small/awkward sizes (exercises the batch-padding + slice path).
    b2, d2 = 10, 32
    key2 = jax.random.fold_in(key, 1)
    x2 = jax.random.uniform(key2, (b2,), minval=0.0, maxval=100.0,
                            dtype=jnp.float32)
    out2 = jax.block_until_ready(sinusoidal_pos_emb(x2, d2))
    ref2 = _reference(x2, d2)
    assert out2.shape == (b2, d2), out2.shape
    assert jnp.allclose(out2, ref2, atol=1e-4, rtol=1e-4), (
        float(jnp.max(jnp.abs(out2 - ref2)))
    )

    # Case 3: forced multi-step grid with balanced tiles (small block_rows),
    # exercises the >1 grid-step pipeline and padded tail.
    b3, d3 = 40, 64
    key3 = jax.random.fold_in(key, 2)
    x3 = jax.random.uniform(key3, (b3,), minval=0.0, maxval=100.0,
                            dtype=jnp.float32)
    out3 = jax.block_until_ready(sinusoidal_pos_emb(x3, d3, block_rows=16))
    ref3 = _reference(x3, d3)
    assert out3.shape == (b3, d3), out3.shape
    assert jnp.allclose(out3, ref3, atol=1e-4, rtol=1e-4), (
        float(jnp.max(jnp.abs(out3 - ref3)))
    )

    print("KERNEL_OK")
</pallas_src>

<mosaic_0001>
module attributes {stable_mosaic.version = 11 : i64} {
  func.func @_sin_pos_emb_kernel(%arg0: i32, %arg1: memref<64x1xf32, #tpu.memory_space<vmem>>, %arg2: memref<2x128xf32, #tpu.memory_space<vmem>>, %arg3: memref<64x128xf32, #tpu.memory_space<vmem>>) attributes {dimension_semantics = [#tpu.dimension_semantics<parallel>], iteration_bounds = array<i64: 1>, scalar_prefetch = 0 : i64, scratch_operands = 0 : i64, tpu.core_type = #tpu.core_type<tc>, window_params = [{transform_indices = @transform_0, window_bounds = array<i64: 64, 1>}, {pipeline_mode = #tpu.pipeline_mode<synchronous>, transform_indices = @transform_1, window_bounds = array<i64: 2, 128>}, {transform_indices = @transform_2, window_bounds = array<i64: 64, 128>}]} {
    %c0 = arith.constant 0 : index
    %c0_0 = arith.constant 0 : index
    %0 = vector.load %arg1[%c0, %c0_0] : memref<64x1xf32, #tpu.memory_space<vmem>>, vector<64x1xf32>
    %c0_1 = arith.constant 0 : index
    %c0_2 = arith.constant 0 : index
    %1 = vector.load %arg2[%c0_1, %c0_2] : memref<2x128xf32, #tpu.memory_space<vmem>>, vector<1x128xf32>
    %c1 = arith.constant 1 : index
    %c0_3 = arith.constant 0 : index
    %2 = vector.load %arg2[%c1, %c0_3] : memref<2x128xf32, #tpu.memory_space<vmem>>, vector<1x128xf32>
    %3 = vector.broadcast %0 : vector<64x1xf32> to vector<64x128xf32>
    %4 = vector.broadcast %1 : vector<1x128xf32> to vector<64x128xf32>
    %5 = arith.mulf %3, %4 : vector<64x128xf32>
    %6 = vector.broadcast %2 : vector<1x128xf32> to vector<64x128xf32>
    %7 = arith.addf %5, %6 : vector<64x128xf32>
    %8 = math.sin %7 : vector<64x128xf32>
    %c0_4 = arith.constant 0 : index
    %c0_5 = arith.constant 0 : index
    %9 = vector.load %arg3[%c0_4, %c0_5] : memref<64x128xf32, #tpu.memory_space<vmem>>, vector<64x128xf32>
    tpu.vector_store %arg3[%c0_4, %c0_5], %8 {strides = array<i32>} : memref<64x128xf32, #tpu.memory_space<vmem>>, vector<64x128xf32>,
    return
  }
  func.func @transform_0(%arg0: i32) -> (i32, i32) {
    %c0_i32 = arith.constant 0 : i32
    %c0_i32_0 = arith.constant 0 : i32
    return %arg0, %c0_i32 : i32, i32
  }
  func.func @transform_1(%arg0: i32) -> (i32, i32) {
    %c0_i32 = arith.constant 0 : i32
    %c0_i32_0 = arith.constant 0 : i32
    %c0_i32_1 = arith.constant 0 : i32
    return %c0_i32, %c0_i32_0 : i32, i32
  }
  func.func @transform_2(%arg0: i32) -> (i32, i32) {
    %c0_i32 = arith.constant 0 : i32
    %c0_i32_0 = arith.constant 0 : i32
    return %arg0, %c0_i32 : i32, i32
  }
}

</mosaic_0001>

<bundles_post_ra>
// kernel: tpu_custom_call.1
= control target key start
LH: loop header
LB: loop body
LE: loop exit
PB: predicated region body
PF: predicated region fallthrough
CT: control target
= control target key end

     0   :  { %v1413_v3 = vmov 0   ;;  %s2338_s0 = inlined_call_operand.vmem [shape: f32[64,1], index: 0, kind: input, shape index: {}]   ;;  %s2339_s1 = inlined_call_operand.vmem [shape: f32[2,128], index: 1, kind: input, shape index: {}]   ;;  %s2340_s2 = inlined_call_operand.hbm [shape: f32[64,128], index: 2, kind: output, shape index: {}]  }
   0x1   :  { %v16_v0 = vld [vmem:[%s2338_s0 + $0x20] sm:$0xff]  ;;  %v14_v1 = vld [vmem:[%s2338_s0 + $0x10] sm:$0xff]  ;;  %1382 = vset.pattern.permute.xlu2 %v1413_v3  ;;  %1381 = vset.pattern.permute.xlu1 %v1413_v3 }
   0x2   :  { %v12_v2 = vld [vmem:[%s2338_s0] sm:$0xff]  ;;  %1380 = vset.pattern.permute.xlu0 %v1413_v3  ;;  %44 = vperm.xlu2 %1382, %v16_v0  }
   0x3   :  { %34 = vperm.xlu1 %1381, %v14_v1   ;;  %24 = vperm.xlu0 %1380, %v12_v2  }
   0x4   :  { %7 = vsyncpa [#allocation3], 0  ;;  %v17_v4 = vld [vmem:[%s2338_s0 + $0x28] sm:$0xff]  ;;  %v15_v5 = vld [vmem:[%s2338_s0 + $0x18] sm:$0xff]  ;;  %v1414_v32 = vmov 683565275  }
   0x5   :  { %v13_v6 = vld [vmem:[%s2338_s0 + $0x8] sm:$0xff]  ;;  %v19_v7 = vld [vmem:[%s2338_s0 + $0x38] sm:$0xff]  ;;  %v18_v8 = vld [vmem:[%s2338_s0 + $0x30] sm:$0xff]  ;;  %v1415_v34 = vmov 2475754826   ;;  %s1334_s5 = sshll.u32 %s2340_s2, 4  ;;  %s1335_s5 = int_to_ptr.hbm [resolvable:$true] %s1334_s5 }
   0x6   :  { %v1468_v9 = vld [vmem:[%s2339_s1] ss:$0 sm:$0xff]  ;;  %v1473_v10 = vld [vmem:[%s2339_s1 + $0x1] ss:$0 sm:$0xff]  ;;  %v1416_v36 = vmov 2131351028  }
   0x7   :  { %v1417_v38 = vmov 2102212464   ;;  %v1418_v40 = vmov 920167782   ;;  %v1419_v49 = vmov 1326507024  }
   0x8   :  { %s1420_s6 = smov [#allocation2]   ;;  %s1421_s8 = smov 128  }
   0x9   :  { %s1332_s7 = sshll.u32 %s1420_s6, 4  ;;  %s1422_s9 = smov 8   ;;  %s1333_s7 = int_to_ptr.vmem [resolvable:$true] %s1332_s7 }
   0xa   :  { %49 = vperm.xlu2 %1382, %v17_v4  }
   0xb   :  { %39 = vperm.xlu1 %1381, %v15_v5   ;;  %29 = vperm.xlu0 %1380, %v13_v6  }
  0x13   :  { %59 = vperm.xlu1 %1381, %v19_v7   ;;  %54 = vperm.xlu0 %1380, %v18_v8  }
  0x5c   :  { %v45_v11 = vpop.permute.xlu2 %44 }
  0x5d   :  { %v67_v12 = vmul.f32 %v1468_v9, %v45_v11 }
  0x5f   :  { %v1477_v13 = vadd.f32 %v1473_v10, %v67_v12 }
  0x61   :  { %v700_v14 = vand.u32 2147483647, %v1477_v13  ;;  %v703_v15 = vand.u32 2139095040, %v1477_v13 }
  0x63   :  { %v704_v16 = vshrl.u32 %v703_v15, 23  ;;  %v707_v17 = vand.u32 8388607, %v700_v14 }
  0x64   :  { %v50_v18 = vpop.permute.xlu2 %49 }
  0x65   :  { %v1358_v19 = vadd.s32 4294967169, %v704_v16  ;;  %v68_v20 = vmul.f32 %v1468_v9, %v50_v18  ;;  %v708_v21 = vor.u32 8388608, %v707_v17 }
  0x67   :  { %v710_v22 = vadd.s32 1, %v1358_v19  ;;  %v1485_v23 = vadd.f32 %v1473_v10, %v68_v20  ;;  %v1487_v25 = vshll.u32 %v708_v21, 8 }
  0x69   :  { %vm711_vm0 = vcmp.gt.s32.totalorder %v710_v22, 0  ;;  %v855_v26 = vand.u32 2147483647, %v1485_v23  ;;  %v858_v27 = vand.u32 2139095040, %v1485_v23  ;;  %v749_v42 = vand.u32 65535, %v1487_v25 }
  0x6a   :  { %v712_v24 = vsel %vm711_vm0, %v710_v22, 0  ;;  %v750_v57 = vshrl.u32 %v1487_v25, 16 }
  0x6b   :  { %v713_v28 = vshrl.u32 %v712_v24, 5  ;;  %v714_v29 = vand.u32 31, %v712_v24  ;;  %v859_v30 = vshrl.u32 %v858_v27, 23  ;;  %v862_v43 = vand.u32 8388607, %v855_v26 }
  0x6d   :  { %v715_v31 = vsub.s32 32, %v714_v29  ;;  %v717_v33 = vshll.u32 %v1414_v32, %v714_v29  ;;  %v720_v35 = vshll.u32 %v1415_v34, %v714_v29  ;;  %v723_v37 = vshll.u32 %v1416_v36, %v714_v29 }
  0x6e   :  { %v726_v39 = vshll.u32 %v1417_v38, %v714_v29  ;;  %v729_v41 = vshll.u32 %v1418_v40, %v714_v29  ;;  %vm732_vm1 = vcmp.lt.s32.totalorder %v713_v28, 1  ;;  %vm735_vm2 = vcmp.lt.s32.totalorder %v713_v28, 4 }
  0x6f   :  { %v718_v44 = vshrl.u32 %v1415_v34, %v715_v31  ;;  %v721_v45 = vshrl.u32 %v1416_v36, %v715_v31  ;;  %v724_v46 = vshrl.u32 %v1417_v38, %v715_v31  ;;  %v716_v47 = vshrl.u32 %v1414_v32, %v715_v31 }
  0x70   :  { %v727_v48 = vshrl.u32 %v1418_v40, %v715_v31  ;;  %v730_v50 = vshrl.u32 %v1419_v49, %v715_v31  ;;  %v1361_v54 = vadd.s32 4294967169, %v859_v30  ;;  %vm734_vm3 = vcmp.lt.s32.totalorder %v713_v28, 3 }
  0x71   :  { %v719_v51 = vor.u32 %v718_v44, %v717_v33  ;;  %v722_v52 = vor.u32 %v721_v45, %v720_v35  ;;  %v725_v53 = vor.u32 %v724_v46, %v723_v37  ;;  %vm733_vm4 = vcmp.lt.s32.totalorder %v713_v28, 2 }
  0x72   :  { %v728_v55 = vor.u32 %v727_v48, %v726_v39  ;;  %v731_v56 = vor.u32 %v730_v50, %v729_v41  ;;  %v863_v63 = vor.u32 8388608, %v862_v43  ;;  %v865_v0 = vadd.s32 1, %v1361_v54 }
  0x73   :  { %v737_v58 = vsel %vm735_vm2, %v725_v53, 2102212464  ;;  %v740_v59 = vsel %vm732_vm1, %v719_v51, %v722_v52  ;;  %v744_v60 = vsel %vm732_vm1, %v722_v52, %v725_v53  ;;  %v736_v1 = vsel %vm732_vm1, %v716_v47, %v719_v51 }
  0x74   :  { %v741_v61 = vsel %vm735_vm2, %v728_v55, 920167782  ;;  %v745_v62 = vsel %vm735_vm2, %v731_v56, 1326507024  ;;  %v738_v2 = vsel %vm734_vm3, %v722_v52, %v737_v58  ;;  %vm866_vm5 = vcmp.gt.s32.totalorder %v865_v0, 0 }
  0x75   :  { %v742_v4 = vsel %vm734_vm3, %v725_v53, %v741_v61  ;;  %v746_v5 = vsel %vm734_vm3, %v728_v55, %v745_v62  ;;  %v1512_v16 = vsel %vm733_vm4, %v736_v1, %v738_v2  ;;  %v1514_v20 = vshll.u32 %v863_v63, 8 }
  0x76   :  { %v743_v6 = vsel %vm733_vm4, %v740_v59, %v742_v4  ;;  %v747_v7 = vsel %vm733_vm4, %v744_v60, %v746_v5  ;;  %v867_v27 = vsel %vm866_vm5, %v865_v0, 0  ;;  %vm702_vm4 = vcmp.lt.s32.totalorder %v1477_v13, 0 }
  0x77   :  { %v751_v8 = vand.u32 65535, %v747_v7  ;;  %v752_v11 = vshrl.u32 %v747_v7, 16  ;;  %v773_v12 = vand.u32 65535, %v743_v6  ;;  %v774_v15 = vshrl.u32 %v743_v6, 16 }
  0x78   :  { %v869_v44 = vand.u32 31, %v867_v27  ;;  %v1521_v53 = vshrl.u32 %v867_v27, 5  ;;  %v904_v27 = vand.u32 65535, %v1514_v20  ;;  %vm1602_vm5 = vcmp.le.f32.partialorder %v700_v14, 0.7853982 }
  0x79   :  { %v753_v17 = vmul.u32 %v751_v8, %v749_v42  ;;  %v754_v18 = vmul.u32 %v752_v11, %v749_v42  ;;  %v755_v19 = vmul.u32 %v751_v8, %v750_v57  ;;  %v775_v21 = vmul.u32 %v773_v12, %v749_v42 }
  0x7a   :  { %v776_v22 = vmul.u32 %v774_v15, %v749_v42  ;;  %v777_v24 = vmul.u32 %v773_v12, %v750_v57  ;;  %v756_v29 = vmul.u32 %v752_v11, %v750_v57  ;;  %v778_v33 = vmul.u32 %v774_v15, %v750_v57 }
  0x7b   :  { %v757_v30 = vshll.u32 %v754_v18, 16  ;;  %v759_v31 = vshll.u32 %v755_v19, 16  ;;  %v758_v35 = vshrl.u32 %v754_v18, 16  ;;  %v760_v37 = vshrl.u32 %v755_v19, 16 }
  0x7c   :  { %v779_v39 = vshll.u32 %v776_v22, 16  ;;  %v781_v41 = vshll.u32 %v777_v24, 16  ;;  %v780_v43 = vshrl.u32 %v776_v22, 16  ;;  %v782_v46 = vshrl.u32 %v777_v24, 16 }
  0x7d   :  { %vm761_vm6 = vc.u32 %v753_v17, %v757_v30  ;;  %v763_v28 = vadd.s32 %v757_v30, %v753_v17  ;;  %v1518_v50 = vsub.s32 32, %v869_v44  ;;  %v872_v57 = vshll.u32 %v1414_v32, %v869_v44 }
  0x7e   :  { %v762_v45 = vsel %vm761_vm6, 1, %v1413_v3  ;;  %vm783_vm7 = vc.u32 %v775_v21, %v779_v39  ;;  %v785_v47 = vadd.s32 %v779_v39, %v775_v21  ;;  %v875_v60 = vshll.u32 %v1415_v34, %v869_v44 }
  0x7f   :  { %v764_v42 = vadd.s32 %v762_v45, %v756_v29  ;;  %vm765_vm8 = vc.u32 %v763_v28, %v759_v31  ;;  %v784_v48 = vsel %vm783_vm7, 1, %v1413_v3  ;;  %v873_v59 = vshrl.u32 %v1415_v34, %v1518_v50 }
  0x80   :  { %v766_v51 = vsel %vm765_vm8, 1, %v1413_v3  ;;  %v786_v52 = vadd.s32 %v784_v48, %v778_v33  ;;  %vm787_vm9 = vc.u32 %v785_v47, %v781_v41  ;;  %v1524_v56 = vadd.s32 %v785_v47, %v781_v41  ;;  %v35_v41 = vpop.permute.xlu1 %34 }
  0x81   :  { %v768_v54 = vadd.s32 %v766_v51, %v764_v42  ;;  %v788_v55 = vsel %vm787_vm9, 1, %v1413_v3  ;;  %v876_v61 = vshrl.u32 %v1416_v36, %v1518_v50  ;;  %v878_v63 = vshll.u32 %v1416_v36, %v869_v44 }
  0x82   :  { %v790_v58 = vadd.s32 %v788_v55, %v786_v52  ;;  %v879_v0 = vshrl.u32 %v1417_v38, %v1518_v50  ;;  %v881_v1 = vshll.u32 %v1417_v38, %v869_v44  ;;  %v1536_v4 = vor.u32 %v873_v59, %v872_v57 }
  0x83   :  { %v769_v62 = vadd.s32 %v768_v54, %v758_v35  ;;  %v1538_v5 = vor.u32 %v876_v61, %v875_v60  ;;  %v882_v6 = vshrl.u32 %v1418_v40, %v1518_v50  ;;  %v884_v11 = vshll.u32 %v1418_v40, %v869_v44 }
  0x84   :  { %v791_v2 = vadd.s32 %v790_v58, %v780_v43  ;;  %v880_v8 = vor.u32 %v879_v0, %v878_v63  ;;  %v885_v12 = vshrl.u32 %v1419_v49, %v1518_v50  ;;  %vm887_vm10 = vcmp.lt.s32.totalorder %v1521_v53, 1 }
  0x85   :  { %v1542_v7 = vadd.s32 %v769_v62, %v760_v37  ;;  %v883_v17 = vor.u32 %v882_v6, %v881_v1  ;;  %v793_v18 = vmul.u32 %v1487_v25, %v1512_v16  ;;  %vm889_vm12 = vcmp.lt.s32.totalorder %v1521_v53, 3 }
  0x86   :  { %v792_v15 = vadd.s32 %v791_v2, %v782_v46  ;;  %v886_v19 = vor.u32 %v885_v12, %v884_v11  ;;  %vm888_vm13 = vcmp.lt.s32.totalorder %v1521_v53, 2  ;;  %vm890_vm14 = vcmp.lt.s32.totalorder %v1521_v53, 4 }
  0x87   :  { %vm795_vm11 = vc.u32 %v1542_v7, %v1524_v56  ;;  %v895_v22 = vsel %vm887_vm10, %v1536_v4, %v1538_v5  ;;  %v896_v24 = vsel %vm890_vm14, %v883_v17, 920167782  ;;  %v899_v25 = vsel %vm887_vm10, %v1538_v5, %v880_v8 }
  0x88   :  { %v796_v21 = vadd.s32 1, %v792_v15  ;;  %v900_v16 = vsel %vm890_vm14, %v886_v19, 1326507024  ;;  %v897_v30 = vsel %vm889_vm12, %v880_v8, %v896_v24  ;;  %v905_v33 = vshrl.u32 %v1514_v20, 16 }
  0x89   :  { %v901_v31 = vsel %vm889_vm12, %v883_v17, %v900_v16  ;;  %v898_v37 = vsel %vm888_vm13, %v895_v22, %v897_v30  ;;  %v65_v51 = vmul.f32 %v1468_v9, %v35_v41  ;;  %v871_v63 = vshrl.u32 %v1414_v32, %v1518_v50  ;;  %v25_v16 = vpop.permute.xlu0 %24 }
  0x8a   :  { %v797_v29 = vsel %vm795_vm11, %v796_v21, %v792_v15  ;;  %v902_v39 = vsel %vm888_vm13, %v899_v25, %v901_v31  ;;  %v928_v44 = vand.u32 65535, %v898_v37  ;;  %v929_v45 = vshrl.u32 %v898_v37, 16 }
  0x8b   :  { %v798_v35 = vadd.s32 %v797_v29, %v793_v18  ;;  %v906_v28 = vand.u32 65535, %v902_v39  ;;  %v907_v43 = vshrl.u32 %v902_v39, 16  ;;  %v1580_v1 = vadd.f32 %v1473_v10, %v65_v51 }
  0x8c   :  { %v931_v55 = vmul.u32 %v929_v45, %v904_v27  ;;  %v930_v59 = vmul.u32 %v928_v44, %v904_v27  ;;  %v932_v60 = vmul.u32 %v928_v44, %v905_v33  ;;  %v933_v12 = vmul.u32 %v929_v45, %v905_v33 }
  0x8d   :  { %v799_v46 = vadd.s32 536870912, %v798_v35  ;;  %v908_v47 = vmul.u32 %v906_v28, %v904_v27  ;;  %v909_v42 = vmul.u32 %v907_v43, %v904_v27  ;;  %v910_v48 = vmul.u32 %v906_v28, %v905_v33 }
  0x8e   :  { %v911_v54 = vmul.u32 %v907_v43, %v905_v33  ;;  %v934_v62 = vshll.u32 %v931_v55, 16  ;;  %v936_v17 = vshll.u32 %v932_v60, 16  ;;  %v892_v19 = vsel %vm890_vm14, %v880_v8, 2102212464 }
  0x8f   :  { %v800_v52 = vshrl.u32 %v799_v46, 30  ;;  %v912_v57 = vshll.u32 %v909_v42, 16  ;;  %v914_v58 = vshll.u32 %v910_v48, 16  ;;  %v913_v6 = vshrl.u32 %v909_v42, 16 }
  0x90   :  { %vm938_vm1 = vc.u32 %v930_v59, %v934_v62  ;;  %v915_v21 = vshrl.u32 %v910_v48, 16  ;;  %v940_v25 = vadd.s32 %v934_v62, %v930_v59  ;;  %v390_v31 = vand.u32 2147483647, %v1580_v1 }
  0x91   :  { %v801_v61 = vshll.u32 %v800_v52, 30  ;;  %vm916_vm15 = vc.u32 %v908_v47, %v912_v57  ;;  %v918_v0 = vadd.s32 %v912_v57, %v908_v47  ;;  %v939_v24 = vsel %vm938_vm1, 1, %v1413_v3 }
  0x92   :  { %v917_v11 = vsel %vm916_vm15, 1, %v1413_v3  ;;  %v824_v29 = vsub.s32 4, %v800_v52  ;;  %v941_v30 = vadd.s32 %v939_v24, %v933_v12  ;;  %v935_v37 = vshrl.u32 %v931_v55, 16 }
  0x93   :  { %v802_v2 = vsub.s32 %v798_v35, %v801_v61  ;;  %v919_v15 = vadd.s32 %v917_v11, %v911_v54  ;;  %vm920_vm0 = vc.u32 %v918_v0, %v914_v58  ;;  %vm942_vm3 = vc.u32 %v940_v25, %v936_v17 }
  0x94   :  { %v921_v50 = vsel %vm920_vm0, 1, %v1413_v3  ;;  %v891_v8 = vsel %vm887_vm10, %v871_v63, %v1536_v4  ;;  %v943_v39 = vsel %vm942_vm3, 1, %v1413_v3  ;;  %v63_v41 = vmul.f32 %v1468_v9, %v25_v16 }
  0x95   :  { %vm803_vm2 = vcmp.lt.s32.totalorder %v802_v2, 0  ;;  %v804_v18 = vsub.s32 0, %v802_v2  ;;  %v923_v22 = vadd.s32 %v921_v50, %v919_v15  ;;  %v893_v43 = vsel %vm889_vm12, %v1538_v5, %v892_v19 }
  0x96   :  { %v937_v44 = vshrl.u32 %v932_v60, 16  ;;  %v945_v45 = vadd.s32 %v943_v39, %v941_v30  ;;  %v944_v47 = vadd.s32 %v940_v25, %v936_v17  ;;  %v393_v42 = vand.u32 2139095040, %v1580_v1 }
  0x97   :  { %v805_v27 = vsel %vm803_vm2, %v804_v18, %v802_v2  ;;  %v924_v35 = vadd.s32 %v923_v22, %v913_v6  ;;  %v397_v48 = vand.u32 8388607, %v390_v31  ;;  %v825_v51 = vsel %vm702_vm4, %v824_v29, %v800_v52 }
  0x98   :  { %v806_v33 = vclz %v805_v27  ;;  %v946_v5 = vadd.s32 %v945_v45, %v935_v37  ;;  %v794_v54 = vadd.s32 %v1524_v56, %v1542_v7  ;;  %v394_v57 = vshrl.u32 %v393_v42, 23 }
  0x99   :  { %v925_v46 = vadd.s32 %v924_v35, %v915_v21  ;;  %v1611_v58 = vadd.f32 %v1473_v10, %v63_v41  ;;  %v894_v14 = vsel %vm888_vm13, %v891_v8, %v893_v43  ;;  %v827_v62 = vsel %vm1602_vm5, 0, %v825_v51 }
  0x9a   :  { %v1359_v28 = vadd.s32 4294967294, %v806_v33  ;;  %v947_v61 = vadd.s32 %v946_v5, %v937_v44  ;;  %v1352_v52 = vadd.s32 4294967169, %v394_v57  ;;  %v398_v63 = vor.u32 8388608, %v397_v48 }
  0x9b   :  { %vm950_vm7 = vc.u32 %v925_v46, %v944_v47  ;;  %v948_v11 = vmul.u32 %v1514_v20, %v894_v14  ;;  %v83_v12 = vand.u32 2139095040, %v1611_v58  ;;  %v844_v18 = vadd.s32 3, %v827_v62 }
  0x9c   :  { %vm1360_vm6 = vcmp.lt.s32.totalorder %v1359_v28, 0  ;;  %v951_v7 = vadd.s32 1, %v947_v61  ;;  %v400_v10 = vadd.s32 1, %v1352_v52  ;;  %v1619_v22 = vshll.u32 %v398_v63, 8 }
  0x9d   :  { %v809_v55 = vsel %vm1360_vm6, 0, %v1359_v28  ;;  %v80_v25 = vand.u32 2147483647, %v1611_v58  ;;  %v84_v16 = vshrl.u32 %v83_v12, 23  ;;  %v1622_v29 = vand.u32 3, %v844_v18 }
  0x9e   :  { %v810_v59 = vsub.s32 32, %v809_v55  ;;  %v814_v60 = vsub.s32 4294967266, %v809_v55  ;;  %v811_v0 = vshll.u32 %v802_v2, %v809_v55  ;;  %v952_v53 = vsel %vm950_vm7, %v951_v7, %v947_v61 }
  0x9f   :  { %v953_v19 = vadd.s32 %v952_v53, %v948_v11  ;;  %vm401_vm8 = vcmp.gt.s32.totalorder %v400_v10, 0  ;;  %vm857_vm9 = vcmp.lt.s32.totalorder %v1485_v23, 0  ;;  %vm1627_vm10 = vcmp.le.f32.partialorder %v855_v26, 0.7853982 }
  0xa0   :  { %v812_v6 = vshrl.u32 %v794_v54, %v810_v59  ;;  %v815_v56 = vadd.s32 127, %v814_v60  ;;  %v402_v21 = vsel %vm401_vm8, %v400_v10, 0  ;;  %v1631_v8 = vadd.s32 %v944_v47, %v925_v46 }
  0xa1   :  { %v954_v24 = vadd.s32 536870912, %v953_v19  ;;  %v404_v2 = vand.u32 31, %v402_v21  ;;  %v1634_v39 = vand.u32 65535, %v1619_v22  ;;  %v1637_v41 = vshrl.u32 %v1619_v22, 16 }
  0xa2   :  { %v813_v15 = vor.u32 %v812_v6, %v811_v0  ;;  %v816_v17 = vshll.u32 %v815_v56, 23  ;;  %v1639_v43 = vshrl.u32 %v402_v21, 5  ;;  %v1346_v44 = vadd.s32 4294967169, %v84_v16 }
  0xa3   :  { %v955_v30 = vshrl.u32 %v954_v24, 30  ;;  %v405_v33 = vsub.s32 32, %v404_v2  ;;  %v1643_v45 = vand.u32 8388607, %v80_v25  ;;  %v407_v48 = vshll.u32 %v1414_v32, %v404_v2 }
  0xa4   :  { %v817_v50 = vor.u32 4788187, %v816_v17  ;;  %v820_v20 = vcvt.s32.f32 %v813_v15  ;;  %v410_v57 = vshll.u32 %v1415_v34, %v404_v2  ;;  %v416_v60 = vshll.u32 %v1417_v38, %v404_v2 }
  0xa5   :  { %v956_v28 = vshll.u32 %v955_v30, 30  ;;  %v979_v42 = vsub.s32 4, %v955_v30  ;;  %v408_v46 = vshrl.u32 %v1415_v34, %v405_v33  ;;  %v411_v51 = vshrl.u32 %v1416_v36, %v405_v33 }
  0xa6   :  { %v818_v27 = vand.u32 2147483647, %v817_v50  ;;  %v417_v5 = vshrl.u32 %v1418_v40, %v405_v33  ;;  %v420_v54 = vshrl.u32 %v1419_v49, %v405_v33  ;;  %v414_v59 = vshrl.u32 %v1417_v38, %v405_v33 }
  0xa7   :  { %v1647_v47 = vsub.s32 %v953_v19, %v956_v28  ;;  %v419_v62 = vshll.u32 %v1418_v40, %v404_v2  ;;  %v980_v63 = vsel %vm857_vm9, %v979_v42, %v955_v30  ;;  %v409_v0 = vor.u32 %v408_v46, %v407_v48 }
  0xa8   :  { %v821_v35 = vmul.f32 %v820_v20, %v818_v27  ;;  %v413_v6 = vshll.u32 %v1416_v36, %v404_v2  ;;  %v412_v4 = vor.u32 %v411_v51, %v410_v57  ;;  %v418_v7 = vor.u32 %v417_v5, %v416_v60 }
  0xa9   :  { %vm958_vm11 = vcmp.lt.s32.totalorder %v1647_v47, 0  ;;  %v959_v61 = vsub.s32 0, %v1647_v47  ;;  %v421_v11 = vor.u32 %v420_v54, %v419_v62  ;;  %v982_v53 = vsel %vm1627_vm10, 0, %v980_v63 }
  0xaa   :  { %v822_v26 = vxor.u32 2147483648, %v821_v35  ;;  %v415_v17 = vor.u32 %v414_v59, %v413_v6  ;;  %v406_v18 = vshrl.u32 %v1414_v32, %v405_v33  ;;  %vm422_vm12 = vcmp.lt.s32.totalorder %v1639_v43, 1 }
  0xab   :  { %v960_v56 = vsel %vm958_vm11, %v959_v61, %v1647_v47  ;;  %v1675_v19 = vadd.s32 1, %v1346_v44  ;;  %vm425_vm13 = vcmp.lt.s32.totalorder %v1639_v43, 4  ;;  %vm424_vm14 = vcmp.lt.s32.totalorder %v1639_v43, 3 }
  0xac   :  { %v823_v55 = vsel %vm702_vm4, %v822_v26, %v821_v35  ;;  %v961_v15 = vclz %v960_v56  ;;  %v430_v2 = vsel %vm422_vm12, %v409_v0, %v412_v4  ;;  %v431_v16 = vsel %vm425_vm13, %v418_v7, 920167782 }
  0xad   :  { %v1660_v14 = vsel %vm1602_vm5, %v1477_v13, %v823_v55  ;;  %v435_v27 = vsel %vm425_vm13, %v421_v11, 1326507024  ;;  %v434_v33 = vsel %vm422_vm12, %v412_v4, %v415_v17  ;;  %v1687_v28 = vadd.s32 3, %v982_v53 }
  0xae   :  { %v828_v52 = vmul.f32 %v1660_v14, %v1660_v14  ;;  %v1362_v24 = vadd.s32 4294967294, %v961_v15  ;;  %v432_v44 = vsel %vm424_vm14, %v415_v17, %v431_v16  ;;  %v436_v26 = vsel %vm424_vm14, %v418_v7, %v435_v27 }
  0xaf   :  { %vm850_vm0 = vcmp.eq.s32.totalorder %v1622_v29, 2  ;;  %vm423_vm1 = vcmp.lt.s32.totalorder %v1639_v43, 2  ;;  %vm847_vm2 = vcmp.eq.s32.totalorder %v1622_v29, 0  ;;  %vm846_vm3 = vcmp.lt.s32.totalorder %v1622_v29, 2 }
  0xb0   :  { %v829_v10 = vmul.f32 -0.001358992, %v828_v52  ;;  %v836_v12 = vmul.f32 -0.00019511016, %v828_v52  ;;  %vm1363_vm15 = vcmp.lt.s32.totalorder %v1362_v24, 0  ;;  %v433_v54 = vsel %vm423_vm1, %v430_v2, %v432_v44 }
  0xb1   :  { %v964_v35 = vsel %vm1363_vm15, 0, %v1362_v24  ;;  %v437_v55 = vsel %vm423_vm1, %v434_v33, %v436_v26  ;;  %vm843_vm4 = vweird.f32 %v1477_v13  ;;  %v463_v6 = vand.u32 65535, %v433_v54 }
  0xb2   :  { %v830_v50 = vadd.f32 0.041655596, %v829_v10  ;;  %v837_v21 = vadd.f32 0.008332121, %v836_v12  ;;  %v965_v46 = vsub.s32 32, %v964_v35  ;;  %v966_v51 = vshll.u32 %v1647_v47, %v964_v35 }
  0xb3   :  { %v969_v5 = vsub.s32 4294967266, %v964_v35  ;;  %v441_v61 = vand.u32 65535, %v437_v55  ;;  %v427_v47 = vsel %vm425_vm13, %v415_v17, 2102212464  ;;  %v442_v63 = vshrl.u32 %v437_v55, 16 }
  0xb4   :  { %v831_v20 = vmul.f32 %v830_v50, %v828_v52  ;;  %v838_v30 = vmul.f32 %v837_v21, %v828_v52  ;;  %v967_v60 = vshrl.u32 %v1631_v8, %v965_v46  ;;  %v464_v10 = vshrl.u32 %v433_v54, 16 }
  0xb5   :  { %v970_v62 = vadd.s32 127, %v969_v5  ;;  %v444_v15 = vmul.u32 %v442_v63, %v1634_v39  ;;  %v445_v8 = vmul.u32 %v441_v61, %v1637_v41  ;;  %v428_v17 = vsel %vm424_vm14, %v412_v4, %v427_v47 }
  0xb6   :  { %v832_v42 = vadd.f32 -0.4999988, %v831_v20  ;;  %v839_v48 = vadd.f32 -0.16666654, %v838_v30  ;;  %v968_v11 = vor.u32 %v967_v60, %v966_v51  ;;  %v443_v21 = vmul.u32 %v441_v61, %v1634_v39 }
  0xb7   :  { %v971_v12 = vshll.u32 %v970_v62, 23  ;;  %v446_v16 = vmul.u32 %v442_v63, %v1637_v41  ;;  %v447_v27 = vshll.u32 %v444_v15, 16  ;;  %v449_v30 = vshll.u32 %v445_v8, 16 }
  0xb8   :  { %v833_v57 = vmul.f32 %v832_v42, %v828_v52  ;;  %v840_v59 = vmul.f32 %v839_v48, %v828_v52  ;;  %v426_v52 = vsel %vm422_vm12, %v406_v18, %v409_v0  ;;  %v975_v2 = vcvt.s32.f32 %v968_v11 }
  0xb9   :  { %v972_v24 = vor.u32 4788187, %v971_v12  ;;  %v465_v0 = vmul.u32 %v463_v6, %v1634_v39  ;;  %v466_v18 = vmul.u32 %v464_v10, %v1634_v39  ;;  %vm451_vm5 = vc.u32 %v443_v21, %v447_v27 }
  0xba   :  { %v834_v56 = vadd.f32 1.0, %v833_v57  ;;  %v841_v7 = vadd.f32 1.0, %v840_v59  ;;  %v453_v35 = vadd.s32 %v447_v27, %v443_v21  ;;  %v452_v44 = vsel %vm451_vm5, 1, %v1413_v3 }
  0xbb   :  { %v973_v33 = vand.u32 2147483647, %v972_v24  ;;  %v467_v26 = vmul.u32 %v463_v6, %v1637_v41  ;;  %v469_v42 = vshll.u32 %v466_v18, 16  ;;  %v454_v51 = vadd.s32 %v452_v44, %v446_v16 }
  0xbc   :  { %v842_v53 = vmul.f32 %v841_v7, %v1660_v14  ;;  %v851_v50 = vxor.u32 2147483648, %v834_v56  ;;  %vm455_vm6 = vc.u32 %v453_v35, %v449_v30  ;;  %v448_v5 = vshrl.u32 %v444_v15, 16 }
  0xbd   :  { %v976_v46 = vmul.f32 %v975_v2, %v973_v33  ;;  %v450_v54 = vshrl.u32 %v445_v8, 16  ;;  %v456_v55 = vsel %vm455_vm6, 1, %v1413_v3  ;;  %v468_v60 = vmul.u32 %v464_v10, %v1637_v41 }
  0xbe   :  { %v848_v20 = vxor.u32 2147483648, %v842_v53  ;;  %v852_v14 = vsel %vm850_vm0, %v851_v50, %v842_v53  ;;  %v458_v59 = vadd.s32 %v456_v55, %v454_v51  ;;  %vm473_vm7 = vc.u32 %v465_v0, %v469_v42 }
  0xbf   :  { %v977_v57 = vxor.u32 2147483648, %v976_v46  ;;  %v471_v61 = vshll.u32 %v467_v26, 16  ;;  %v474_v29 = vsel %vm473_vm7, 1, %v1413_v3  ;;  %v475_v62 = vadd.s32 %v469_v42, %v465_v0 }
  0xc0   :  { %v849_v4 = vsel %vm847_vm2, %v834_v56, %v848_v20  ;;  %vm91_vm8 = vcmp.gt.s32.totalorder %v1675_v19, 0  ;;  %v459_v47 = vadd.s32 %v458_v59, %v448_v5  ;;  %v476_v63 = vadd.s32 %v474_v29, %v468_v60 }
  0xc1   :  { %v853_v48 = vsel %vm846_vm3, %v849_v4, %v852_v14  ;;  %v978_v13 = vsel %vm857_vm9, %v977_v57, %v976_v46  ;;  %v92_v6 = vsel %vm91_vm8, %v1675_v19, 0  ;;  %v429_v41 = vsel %vm423_vm1, %v426_v52, %v428_v17 }
  0xc2   :  { %v854_v39 = vsel %vm843_vm4, nan, %v853_v48  ;;  %v981_v56 = vsel %vm1627_vm10, %v1485_v23, %v978_v13  ;;  %vm477_vm11 = vc.u32 %v475_v62, %v471_v61  ;;  %v88_v7 = vor.u32 8388608, %v1643_v45 }
  0xc3   :  { %1324 = vst [vmem:[#allocation2 + $0x20] sm:$0xff] %v854_v39  ;;  %v983_v11 = vmul.f32 %v981_v56, %v981_v56  ;;  %v1740_v10 = vadd.s32 %v459_v47, %v450_v54  ;;  %v478_v12 = vsel %vm477_vm11, 1, %v1413_v3  ;;  %v94_v15 = vand.u32 31, %v92_v6 }
  0xc4   :  { %v1744_v8 = vand.u32 3, %v1687_v28  ;;  %v470_v19 = vshrl.u32 %v466_v18, 16  ;;  %v1746_v53 = vadd.s32 %v475_v62, %v471_v61  ;;  %v480_v37 = vadd.s32 %v478_v12, %v476_v63 }
  0xc5   :  { %v984_v50 = vmul.f32 -0.001358992, %v983_v11  ;;  %v991_v21 = vmul.f32 -0.00019511016, %v983_v11  ;;  %v472_v43 = vshrl.u32 %v467_v26, 16  ;;  %v483_v52 = vmul.u32 %v1619_v22, %v429_v41 }
  0xc6   :  { %v481_v17 = vadd.s32 %v480_v37, %v470_v19  ;;  %vm485_vm9 = vc.u32 %v1740_v10, %v1746_v53  ;;  %v1751_v45 = vshrl.u32 %v92_v6, 5  ;;  %v1753_v24 = vsub.s32 32, %v94_v15 }
  0xc7   :  { %v985_v2 = vadd.f32 0.041655596, %v984_v50  ;;  %v992_v28 = vadd.f32 0.008332121, %v991_v21  ;;  %v97_v16 = vshll.u32 %v1414_v32, %v94_v15  ;;  %v100_v27 = vshll.u32 %v1415_v34, %v94_v15 }
  0xc8   :  { %v482_v20 = vadd.s32 %v481_v17, %v472_v43  ;;  %v98_v30 = vshrl.u32 %v1415_v34, %v1753_v24  ;;  %v101_v22 = vshrl.u32 %v1416_v36, %v1753_v24  ;;  %v106_v0 = vshll.u32 %v1417_v38, %v94_v15 }
  0xc9   :  { %v986_v18 = vmul.f32 %v985_v2, %v983_v11  ;;  %v993_v14 = vmul.f32 %v992_v28, %v983_v11  ;;  %v104_v33 = vshrl.u32 %v1417_v38, %v1753_v24  ;;  %v107_v35 = vshrl.u32 %v1418_v40, %v1753_v24 }
  0xca   :  { %v486_v4 = vadd.s32 1, %v482_v20  ;;  %v1766_v44 = vor.u32 %v98_v30, %v97_v16  ;;  %v1768_v26 = vor.u32 %v101_v22, %v100_v27  ;;  %v103_v42 = vshll.u32 %v1416_v36, %v94_v15 }
  0xcb   :  { %v987_v48 = vadd.f32 -0.4999988, %v986_v18  ;;  %v994_v46 = vadd.f32 -0.16666654, %v993_v14  ;;  %v108_v51 = vor.u32 %v107_v35, %v106_v0  ;;  %vm112_vm10 = vcmp.lt.s32.totalorder %v1751_v45, 1 }
  0xcc   :  { %v487_v39 = vsel %vm485_vm9, %v486_v4, %v482_v20  ;;  %v105_v5 = vor.u32 %v104_v33, %v103_v42  ;;  %v109_v54 = vshll.u32 %v1418_v40, %v94_v15  ;;  %v110_v55 = vshrl.u32 %v1419_v49, %v1753_v24 }
  0xcd   :  { %v988_v57 = vmul.f32 %v987_v48, %v983_v11  ;;  %v995_v59 = vmul.f32 %v994_v46, %v983_v11  ;;  %v488_v60 = vadd.s32 %v487_v39, %v483_v52  ;;  %vm115_vm12 = vcmp.lt.s32.totalorder %v1751_v45, 4 }
  0xce   :  { %v111_v61 = vor.u32 %v110_v55, %v109_v54  ;;  %v120_v29 = vsel %vm112_vm10, %v1766_v44, %v1768_v26  ;;  %v121_v62 = vsel %vm115_vm12, %v108_v51, 920167782  ;;  %v1785_v13 = vshll.u32 %v88_v7, 8 }
  0xcf   :  { %v989_v47 = vadd.f32 1.0, %v988_v57  ;;  %v996_v63 = vadd.f32 1.0, %v995_v59  ;;  %v489_v6 = vadd.s32 536870912, %v488_v60  ;;  %vm114_vm13 = vcmp.lt.s32.totalorder %v1751_v45, 3 }
  0xd0   :  { %vm113_vm14 = vcmp.lt.s32.totalorder %v1751_v45, 2  ;;  %v122_v41 = vsel %vm114_vm13, %v105_v5, %v121_v62  ;;  %v124_v11 = vsel %vm112_vm10, %v1768_v26, %v105_v5  ;;  %v125_v12 = vsel %vm115_vm12, %v111_v61, 1326507024 }
  0xd1   :  { %v997_v15 = vmul.f32 %v996_v63, %v981_v56  ;;  %v1006_v7 = vxor.u32 2147483648, %v989_v47  ;;  %v1796_v19 = vshrl.u32 %v489_v6, 30  ;;  %v123_v37 = vsel %vm113_vm14, %v120_v29, %v122_v41 }
  0xd2   :  { %vm1001_vm15 = vcmp.lt.s32.totalorder %v1744_v8, 2  ;;  %v126_v50 = vsel %vm114_vm13, %v108_v51, %v125_v12  ;;  %v154_v21 = vshrl.u32 %v123_v37, 16  ;;  %vm1005_vm0 = vcmp.eq.s32.totalorder %v1744_v8, 2 }
  0xd3   :  { %v1003_v43 = vxor.u32 2147483648, %v997_v15  ;;  %v491_v52 = vshll.u32 %v1796_v19, 30  ;;  %v129_v17 = vand.u32 65535, %v1785_v13  ;;  %vm1002_vm1 = vcmp.eq.s32.totalorder %v1744_v8, 0 }
  0xd4   :  { %v1007_v56 = vsel %vm1005_vm0, %v1006_v7, %v997_v15  ;;  %v127_v2 = vsel %vm113_vm14, %v124_v11, %v126_v50  ;;  %v153_v28 = vand.u32 65535, %v123_v37  ;;  %vm998_vm2 = vweird.f32 %v1485_v23  ;;  %v40_v37 = vpop.permute.xlu1 %39  ;;  %v30_v50 = vpop.permute.xlu0 %29 }
  0xd5   :  { %v1004_v16 = vsel %vm1002_vm1, %v989_v47, %v1003_v43  ;;  %v492_v27 = vsub.s32 %v488_v60, %v491_v52  ;;  %v131_v20 = vand.u32 65535, %v127_v2  ;;  %v1809_v30 = vmul.u32 %v154_v21, %v129_v17 }
  0xd6   :  { %v1008_v22 = vsel %vm1001_vm15, %v1004_v16, %v1007_v56  ;;  %v130_v0 = vshrl.u32 %v1785_v13, 16  ;;  %v132_v18 = vshrl.u32 %v127_v2, 16  ;;  %v96_v35 = vshrl.u32 %v1414_v32, %v1753_v24 }
  0xd7   :  { %v1009_v14 = vsel %vm998_vm2, nan, %v1008_v22  ;;  %vm493_vm3 = vcmp.lt.s32.totalorder %v492_v27, 0  ;;  %v494_v33 = vsub.s32 0, %v492_v27  ;;  %v117_v4 = vsel %vm115_vm12, %v105_v5, 2102212464 }
  0xd8   :  { %1325 = vst [vmem:[#allocation2 + $0x28] sm:$0xff] %v1009_v14  ;;  %v134_v42 = vmul.u32 %v132_v18, %v129_v17  ;;  %v135_v48 = vmul.u32 %v131_v20, %v130_v0  ;;  %v484_v23 = vadd.s32 %v1746_v53, %v1740_v10  ;;  %v157_v46 = vmul.u32 %v153_v28, %v130_v0 }
  0xd9   :  { %v495_v8 = vsel %vm493_vm3, %v494_v33, %v492_v27  ;;  %v159_v51 = vshll.u32 %v1809_v30, 16  ;;  %v116_v54 = vsel %vm112_vm10, %v96_v35, %v1766_v44  ;;  %v133_v55 = vmul.u32 %v131_v20, %v129_v17 }
  0xda   :  { %v496_v39 = vclz %v495_v8  ;;  %v137_v57 = vshll.u32 %v134_v42, 16  ;;  %v118_v24 = vsel %vm114_vm13, %v1768_v26, %v117_v4  ;;  %v136_v5 = vmul.u32 %v132_v18, %v130_v0 }
  0xdb   :  { %v155_v59 = vmul.u32 %v153_v28, %v129_v17  ;;  %v158_v60 = vmul.u32 %v154_v21, %v130_v0  ;;  %v139_v10 = vshll.u32 %v135_v48, 16  ;;  %v161_v62 = vshll.u32 %v157_v46, 16 }
  0xdc   :  { %v1353_v61 = vadd.s32 4294967294, %v496_v39  ;;  %vm141_vm4 = vc.u32 %v133_v55, %v137_v57  ;;  %v143_v53 = vadd.s32 %v137_v57, %v133_v55  ;;  %v138_v15 = vshrl.u32 %v134_v42, 16 }
  0xdd   :  { %v142_v29 = vsel %vm141_vm4, 1, %v1413_v3  ;;  %vm163_vm5 = vc.u32 %v155_v59, %v159_v51  ;;  %v165_v47 = vadd.s32 %v159_v51, %v155_v59  ;;  %v140_v43 = vshrl.u32 %v135_v48, 16 }
  0xde   :  { %vm1354_vm6 = vcmp.lt.s32.totalorder %v1353_v61, 0  ;;  %v144_v44 = vadd.s32 %v142_v29, %v136_v5  ;;  %vm145_vm7 = vc.u32 %v143_v53, %v139_v10  ;;  %v164_v63 = vsel %vm163_vm5, 1, %v1413_v3 }
  0xdf   :  { %v499_v6 = vsel %vm1354_vm6, 0, %v1353_v61  ;;  %v146_v26 = vsel %vm145_vm7, 1, %v1413_v3  ;;  %v166_v41 = vadd.s32 %v164_v63, %v158_v60  ;;  %vm167_vm8 = vc.u32 %v165_v47, %v161_v62 }
  0xe0   :  { %v500_v11 = vsub.s32 32, %v499_v6  ;;  %v504_v12 = vsub.s32 4294967266, %v499_v6  ;;  %v148_v7 = vadd.s32 %v146_v26, %v144_v44  ;;  %v501_v21 = vshll.u32 %v492_v27, %v499_v6 }
  0xe1   :  { %v160_v52 = vshrl.u32 %v1809_v30, 16  ;;  %v168_v17 = vsel %vm167_vm8, 1, %v1413_v3  ;;  %v514_v20 = vsub.s32 4, %v1796_v19  ;;  %v162_v22 = vshrl.u32 %v157_v46, 16  ;;  %v1839_v30 = vld [vmem:[%s2339_s1 + $0x1] ss:$0 sm:$0xff] }
  0xe2   :  { %v502_v56 = vshrl.u32 %v484_v23, %v500_v11  ;;  %v505_v2 = vadd.s32 127, %v504_v12  ;;  %v149_v28 = vadd.s32 %v148_v7, %v138_v15  ;;  %v170_v16 = vadd.s32 %v168_v17, %v166_v41 }
  0xe3   :  { %v66_v0 = vmul.f32 %v1468_v9, %v40_v37  ;;  %v64_v18 = vmul.f32 %v1468_v9, %v30_v50  ;;  %v169_v4 = vadd.s32 %v165_v47, %v161_v62  ;;  %v119_v23 = vsel %vm113_vm14, %v116_v54, %v118_v24 }
  0xe4   :  { %v503_v14 = vor.u32 %v502_v56, %v501_v21  ;;  %v506_v33 = vshll.u32 %v505_v2, 23  ;;  %v150_v35 = vadd.s32 %v149_v28, %v140_v43  ;;  %v171_v27 = vadd.s32 %v170_v16, %v160_v52 }
  0xe5   :  { %v1842_v42 = vadd.f32 %v1839_v30, %v66_v0  ;;  %v1847_v9 = vadd.f32 %v1839_v30, %v64_v18  ;;  %vm392_vm11 = vcmp.lt.s32.totalorder %v1580_v1, 0  ;;  %v173_v45 = vmul.u32 %v1785_v13, %v119_v23 }
  0xe6   :  { %v507_v48 = vor.u32 4788187, %v506_v33  ;;  %v172_v8 = vadd.s32 %v171_v27, %v162_v22  ;;  %vm175_vm9 = vc.u32 %v150_v35, %v169_v4  ;;  %v510_v55 = vcvt.s32.f32 %v503_v14 }
  0xe7   :  { %v545_v46 = vand.u32 2147483647, %v1842_v42  ;;  %v548_v51 = vand.u32 2139095040, %v1842_v42  ;;  %v515_v57 = vsel %vm392_vm11, %v514_v20, %v1796_v19  ;;  %vm391_vm10 = vcmp.le.f32.partialorder %v390_v31, 0.7853982 }
  0xe8   :  { %v508_v39 = vand.u32 2147483647, %v507_v48  ;;  %v176_v5 = vadd.s32 1, %v172_v8  ;;  %v238_v61 = vand.u32 2139095040, %v1847_v9  ;;  %v517_v10 = vsel %vm391_vm10, 0, %v515_v57 }
  0xe9   :  { %v549_v54 = vshrl.u32 %v548_v51, 23  ;;  %v552_v24 = vand.u32 8388607, %v545_v46  ;;  %v534_v6 = vadd.s32 3, %v517_v10  ;;  %vm1870_vm13 = vcmp.le.f32.partialorder %v80_v25, 0.7853982 }
  0xea   :  { %v511_v59 = vmul.f32 %v510_v55, %v508_v39  ;;  %v177_v60 = vsel %vm175_vm9, %v176_v5, %v172_v8  ;;  %v239_v63 = vshrl.u32 %v238_v61, 23  ;;  %vm82_vm14 = vcmp.lt.s32.totalorder %v1611_v58, 0 }
  0xeb   :  { %v178_v53 = vadd.s32 %v177_v60, %v173_v45  ;;  %v1355_v29 = vadd.s32 4294967169, %v549_v54  ;;  %v553_v47 = vor.u32 8388608, %v552_v24  ;;  %v1876_v17 = vand.u32 3, %v534_v6 }
  0xec   :  { %v512_v62 = vxor.u32 2147483648, %v511_v59  ;;  %v1349_v21 = vadd.s32 4294967169, %v239_v63  ;;  %v174_v56 = vadd.s32 %v169_v4, %v150_v35  ;;  %v235_v28 = vand.u32 2147483647, %v1847_v9 }
  0xed   :  { %v179_v19 = vadd.s32 536870912, %v178_v53  ;;  %v555_v44 = vadd.s32 1, %v1355_v29  ;;  %v1874_v15 = vshll.u32 %v553_v47, 8  ;;  %vm540_vm0 = vcmp.eq.s32.totalorder %v1876_v17, 2 }
  0xee   :  { %v513_v13 = vsel %vm392_vm11, %v512_v62, %v511_v59  ;;  %v1894_v33 = vadd.s32 1, %v1349_v21  ;;  %vm537_vm1 = vcmp.eq.s32.totalorder %v1876_v17, 0  ;;  %vm536_vm2 = vcmp.lt.s32.totalorder %v1876_v17, 2 }
  0xef   :  { %v1864_v26 = vsel %vm391_vm10, %v1580_v1, %v513_v13  ;;  %v180_v31 = vshrl.u32 %v179_v19, 30  ;;  %vm556_vm12 = vcmp.gt.s32.totalorder %v555_v44, 0  ;;  %v1883_v22 = vand.u32 65535, %v1874_v15 }
  0xf0   :  { %v518_v41 = vmul.f32 %v1864_v26, %v1864_v26  ;;  %v557_v12 = vsel %vm556_vm12, %v555_v44, 0  ;;  %v1886_v0 = vshrl.u32 %v1874_v15, 16  ;;  %vm533_vm3 = vweird.f32 %v1580_v1 }
  0xf1   :  { %v181_v7 = vshll.u32 %v180_v31, 30  ;;  %v204_v37 = vsub.s32 4, %v180_v31  ;;  %v559_v50 = vand.u32 31, %v557_v12  ;;  %v1899_v8 = vshrl.u32 %v557_v12, 5 }
  0xf2   :  { %v519_v43 = vmul.f32 -0.001358992, %v518_v41  ;;  %v526_v52 = vmul.f32 -0.00019511016, %v518_v41  ;;  %vm246_vm4 = vcmp.gt.s32.totalorder %v1894_v33, 0 }
  0xf3   :  { %v1879_v2 = vsub.s32 %v178_v53, %v181_v7  ;;  %v560_v25 = vsub.s32 32, %v559_v50  ;;  %v1892_v14 = vsel %vm82_vm14, %v204_v37, %v180_v31  ;;  %v562_v51 = vshll.u32 %v1414_v32, %v559_v50 }
  0xf4   :  { %v520_v16 = vadd.f32 0.041655596, %v519_v43  ;;  %v527_v20 = vadd.f32 0.008332121, %v526_v52  ;;  %v565_v39 = vshll.u32 %v1415_v34, %v559_v50  ;;  %v207_v54 = vsel %vm1870_vm13, 0, %v1892_v14 }
  0xf5   :  { %vm183_vm15 = vcmp.lt.s32.totalorder %v1879_v2, 0  ;;  %v184_v18 = vsub.s32 0, %v1879_v2  ;;  %v563_v4 = vshrl.u32 %v1415_v34, %v560_v25  ;;  %v566_v48 = vshrl.u32 %v1416_v36, %v560_v25 }
  0xf6   :  { %v521_v35 = vmul.f32 %v520_v16, %v518_v41  ;;  %v528_v27 = vmul.f32 %v527_v20, %v518_v41  ;;  %v569_v45 = vshrl.u32 %v1417_v38, %v560_v25  ;;  %v561_v24 = vshrl.u32 %v1414_v32, %v560_v25 }
  0xf7   :  { %v185_v23 = vsel %vm183_vm15, %v184_v18, %v1879_v2  ;;  %v564_v59 = vor.u32 %v563_v4, %v562_v51  ;;  %v568_v60 = vshll.u32 %v1416_v36, %v559_v50  ;;  %v567_v29 = vor.u32 %v566_v48, %v565_v39 }
  0xf8   :  { %v522_v55 = vadd.f32 -0.4999988, %v521_v35  ;;  %v529_v57 = vadd.f32 -0.16666654, %v528_v27  ;;  %v186_v5 = vclz %v185_v23  ;;  %v571_v62 = vshll.u32 %v1417_v38, %v559_v50 }
  0xf9   :  { %v572_v47 = vshrl.u32 %v1418_v40, %v560_v25  ;;  %v574_v19 = vshll.u32 %v1418_v40, %v559_v50  ;;  %v575_v44 = vshrl.u32 %v1419_v49, %v560_v25  ;;  %v570_v6 = vor.u32 %v569_v45, %v568_v60 }
  0xfa   :  { %v523_v61 = vmul.f32 %v522_v55, %v518_v41  ;;  %v530_v10 = vmul.f32 %v529_v57, %v518_v41  ;;  %v1347_v53 = vadd.s32 4294967294, %v186_v5  ;;  %vm577_vm6 = vcmp.lt.s32.totalorder %v1899_v8, 1 }
  0xfb   :  { %v573_v41 = vor.u32 %v572_v47, %v571_v62  ;;  %v576_v12 = vor.u32 %v575_v44, %v574_v19  ;;  %vm578_vm7 = vcmp.lt.s32.totalorder %v1899_v8, 2  ;;  %vm579_vm8 = vcmp.lt.s32.totalorder %v1899_v8, 3 }
  0xfc   :  { %v524_v63 = vadd.f32 1.0, %v523_v61  ;;  %v531_v13 = vadd.f32 1.0, %v530_v10  ;;  %vm1348_vm5 = vcmp.lt.s32.totalorder %v1347_v53, 0  ;;  %vm580_vm11 = vcmp.lt.s32.totalorder %v1899_v8, 4 }
  0xfd   :  { %v189_v31 = vsel %vm1348_vm5, 0, %v1347_v53  ;;  %v581_v16 = vsel %vm577_vm6, %v561_v24, %v564_v59  ;;  %v582_v20 = vsel %vm580_vm11, %v570_v6, 2102212464  ;;  %v586_v14 = vsel %vm580_vm11, %v573_v41, 920167782 }
  0xfe   :  { %v532_v7 = vmul.f32 %v531_v13, %v1864_v26  ;;  %v541_v37 = vxor.u32 2147483648, %v524_v63  ;;  %v190_v21 = vsub.s32 32, %v189_v31  ;;  %v191_v50 = vshll.u32 %v1879_v2, %v189_v31 }
  0xff   :  { %v194_v43 = vsub.s32 4294967266, %v189_v31  ;;  %v585_v2 = vsel %vm577_vm6, %v564_v59, %v567_v29  ;;  %v583_v27 = vsel %vm579_vm8, %v567_v29, %v582_v20  ;;  %v587_v4 = vsel %vm579_vm8, %v570_v6, %v586_v14 }
 0x100   :  { %v538_v52 = vxor.u32 2147483648, %v532_v7  ;;  %v192_v25 = vshrl.u32 %v174_v56, %v190_v21  ;;  %v542_v26 = vsel %vm540_vm0, %v541_v37, %v532_v7  ;;  %v588_v51 = vsel %vm578_vm7, %v585_v2, %v587_v4 }
 0x101   :  { %v195_v18 = vadd.s32 127, %v194_v43  ;;  %v589_v39 = vsel %vm577_vm6, %v567_v29, %v570_v6  ;;  %v224_v57 = vadd.s32 3, %v207_v54  ;;  %v590_v5 = vsel %vm580_vm11, %v576_v12, 1326507024 }
 0x102   :  { %v539_v35 = vsel %vm537_vm1, %v524_v63, %v538_v52  ;;  %v193_v56 = vor.u32 %v192_v25, %v191_v50  ;;  %v618_v45 = vand.u32 65535, %v588_v51  ;;  %v1952_v17 = vsel %vm578_vm7, %v581_v16, %v583_v27 }
 0x103   :  { %v543_v48 = vsel %vm536_vm2, %v539_v35, %v542_v26  ;;  %v196_v23 = vshll.u32 %v195_v18, 23  ;;  %v591_v59 = vsel %vm579_vm8, %v573_v41, %v590_v5  ;;  %v619_v60 = vshrl.u32 %v588_v51, 16 }
 0x104   :  { %v544_v55 = vsel %vm533_vm3, nan, %v543_v48  ;;  %v200_v61 = vcvt.s32.f32 %v193_v56  ;;  %v592_v1 = vsel %vm578_vm7, %v589_v39, %v591_v59  ;;  %v622_v54 = vmul.u32 %v618_v45, %v1886_v0 }
 0x105   :  { %1322 = vst [vmem:[#allocation2 + $0x10] sm:$0xff] %v544_v55  ;;  %v197_v24 = vor.u32 4788187, %v196_v23  ;;  %v247_v10 = vsel %vm246_vm4, %v1894_v33, 0  ;;  %v596_v29 = vand.u32 65535, %v592_v1  ;;  %v597_v62 = vshrl.u32 %v592_v1, 16 }
 0x106   :  { %v621_v47 = vmul.u32 %v619_v60, %v1883_v22  ;;  %v1963_v19 = vand.u32 3, %v224_v57  ;;  %v638_v44 = vmul.u32 %v1874_v15, %v1952_v17  ;;  %v1969_v8 = vand.u32 8388607, %v235_v28 }
 0x107   :  { %v198_v53 = vand.u32 2147483647, %v197_v24  ;;  %v599_v13 = vmul.u32 %v597_v62, %v1883_v22  ;;  %v600_v6 = vmul.u32 %v596_v29, %v1886_v0  ;;  %v620_v33 = vmul.u32 %v618_v45, %v1883_v22 }
 0x108   :  { %v623_v31 = vmul.u32 %v619_v60, %v1886_v0  ;;  %v624_v41 = vshll.u32 %v621_v47, 16  ;;  %v626_v12 = vshll.u32 %v622_v54, 16  ;;  %v249_v7 = vand.u32 31, %v247_v10 }
 0x109   :  { %v201_v63 = vmul.f32 %v200_v61, %v198_v53  ;;  %v598_v21 = vmul.u32 %v596_v29, %v1883_v22  ;;  %v601_v50 = vmul.u32 %v597_v62, %v1886_v0  ;;  %v602_v43 = vshll.u32 %v599_v13, 16 }
 0x10a   :  { %v604_v52 = vshll.u32 %v600_v6, 16  ;;  %vm628_vm9 = vc.u32 %v620_v33, %v624_v41  ;;  %v630_v25 = vadd.s32 %v624_v41, %v620_v33  ;;  %v1977_v16 = vsub.s32 32, %v249_v7 }
 0x10b   :  { %v202_v37 = vxor.u32 2147483648, %v201_v63  ;;  %vm606_vm10 = vc.u32 %v598_v21, %v602_v43  ;;  %v608_v26 = vadd.s32 %v602_v43, %v598_v21  ;;  %v629_v18 = vsel %vm628_vm9, 1, %v1413_v3 }
 0x10c   :  { %v607_v22 = vsel %vm606_vm10, 1, %v1413_v3  ;;  %v631_v0 = vadd.s32 %v629_v18, %v623_v31  ;;  %vm632_vm12 = vc.u32 %v630_v25, %v626_v12  ;;  %v625_v4 = vshrl.u32 %v621_v47, 16 }
 0x10d   :  { %v203_v20 = vsel %vm82_vm14, %v202_v37, %v201_v63  ;;  %v609_v35 = vadd.s32 %v607_v22, %v601_v50  ;;  %vm610_vm15 = vc.u32 %v608_v26, %v604_v52  ;;  %v633_v56 = vsel %vm632_vm12, 1, %v1413_v3 }
 0x10e   :  { %v206_v2 = vsel %vm1870_vm13, %v1611_v58, %v203_v20  ;;  %v611_v27 = vsel %vm610_vm15, 1, %v1413_v3  ;;  %v627_v48 = vshrl.u32 %v622_v54, 16  ;;  %v635_v23 = vadd.s32 %v633_v56, %v631_v0 }
 0x10f   :  { %v208_v14 = vmul.f32 %v206_v2, %v206_v2  ;;  %v603_v55 = vshrl.u32 %v599_v13, 16  ;;  %v613_v57 = vadd.s32 %v611_v27, %v609_v35  ;;  %v605_v11 = vshrl.u32 %v600_v6, 16 }
 0x110   :  { %v1988_v5 = vadd.s32 %v630_v25, %v626_v12  ;;  %v636_v45 = vadd.s32 %v635_v23, %v625_v4  ;;  %v1990_v24 = vshrl.u32 %v247_v10, 5  ;;  %v253_v1 = vshrl.u32 %v1415_v34, %v1977_v16 }
 0x111   :  { %v209_v51 = vmul.f32 -0.001358992, %v208_v14  ;;  %v216_v39 = vmul.f32 -0.00019511016, %v208_v14  ;;  %v614_v61 = vadd.s32 %v613_v57, %v603_v55  ;;  %v252_v54 = vshll.u32 %v1414_v32, %v249_v7 }
 0x112   :  { %v637_v53 = vadd.s32 %v636_v45, %v627_v48  ;;  %v255_v29 = vshll.u32 %v1415_v34, %v249_v7  ;;  %v256_v62 = vshrl.u32 %v1416_v36, %v1977_v16  ;;  %v258_v10 = vshll.u32 %v1416_v36, %v249_v7 }
 0x113   :  { %v210_v59 = vadd.f32 0.041655596, %v209_v51  ;;  %v217_v60 = vadd.f32 0.008332121, %v216_v39  ;;  %v1998_v13 = vadd.s32 %v614_v61, %v605_v11  ;;  %v259_v33 = vshrl.u32 %v1417_v38, %v1977_v16 }
 0x114   :  { %v641_v6 = vadd.s32 1, %v637_v53  ;;  %v261_v31 = vshll.u32 %v1417_v38, %v249_v7  ;;  %v262_v41 = vshrl.u32 %v1418_v40, %v1977_v16  ;;  %v254_v21 = vor.u32 %v253_v1, %v252_v54 }
 0x115   :  { %v211_v47 = vmul.f32 %v210_v59, %v208_v14  ;;  %v218_v63 = vmul.f32 %v217_v60, %v208_v14  ;;  %vm640_vm13 = vc.u32 %v1998_v13, %v1988_v5  ;;  %v264_v52 = vshll.u32 %v1418_v40, %v249_v7 }
 0x116   :  { %v642_v50 = vsel %vm640_vm13, %v641_v6, %v637_v53  ;;  %v263_v43 = vor.u32 %v262_v41, %v261_v31  ;;  %v265_v25 = vshrl.u32 %v1419_v49, %v1977_v16  ;;  %v2014_v22 = vor.u32 %v256_v62, %v255_v29 }
 0x117   :  { %v212_v12 = vadd.f32 -0.4999988, %v211_v47  ;;  %v219_v37 = vadd.f32 -0.16666654, %v218_v63  ;;  %v643_v18 = vadd.s32 %v642_v50, %v638_v44  ;;  %vm223_vm14 = vweird.f32 %v1611_v58 }
 0x118   :  { %v243_v0 = vor.u32 8388608, %v1969_v8  ;;  %v2018_v35 = vor.u32 %v259_v33, %v258_v10  ;;  %v266_v56 = vor.u32 %v265_v25, %v264_v52  ;;  %vm270_vm0 = vcmp.lt.s32.totalorder %v1990_v24, 4 }
 0x119   :  { %v213_v20 = vmul.f32 %v212_v12, %v208_v14  ;;  %v220_v26 = vmul.f32 %v219_v37, %v208_v14  ;;  %v644_v4 = vadd.s32 536870912, %v643_v18  ;;  %vm226_vm1 = vcmp.lt.s32.totalorder %v1963_v19, 2 }
 0x11a   :  { %vm267_vm2 = vcmp.lt.s32.totalorder %v1990_v24, 1  ;;  %vm269_vm3 = vcmp.lt.s32.totalorder %v1990_v24, 3  ;;  %v276_v15 = vsel %vm270_vm0, %v263_v43, 920167782  ;;  %v280_v51 = vsel %vm270_vm0, %v266_v56, 1326507024 }
 0x11b   :  { %v214_v27 = vadd.f32 1.0, %v213_v20  ;;  %v221_v7 = vadd.f32 1.0, %v220_v26  ;;  %v2026_v8 = vshrl.u32 %v644_v4, 30  ;;  %v275_v14 = vsel %vm267_vm2, %v254_v21, %v2014_v22 }
 0x11c   :  { %v277_v48 = vsel %vm269_vm3, %v2018_v35, %v276_v15  ;;  %v279_v23 = vsel %vm267_vm2, %v2014_v22, %v2018_v35  ;;  %vm230_vm4 = vcmp.eq.s32.totalorder %v1963_v19, 2  ;;  %vm268_vm5 = vcmp.lt.s32.totalorder %v1990_v24, 2 }
 0x11d   :  { %v222_v17 = vmul.f32 %v221_v7, %v206_v2  ;;  %v231_v44 = vxor.u32 2147483648, %v214_v27  ;;  %v2040_v2 = vshll.u32 %v243_v0, 8  ;;  %v646_v55 = vshll.u32 %v2026_v8, 30 }
 0x11e   :  { %vm227_vm6 = vcmp.eq.s32.totalorder %v1963_v19, 0  ;;  %v278_v11 = vsel %vm268_vm5, %v275_v14, %v277_v48  ;;  %v281_v45 = vsel %vm269_vm3, %v263_v43, %v280_v51  ;;  %v251_v31 = vshrl.u32 %v1414_v32, %v1977_v16  ;;  %v60_v48 = vpop.permute.xlu1 %59 }
 0x11f   :  { %v228_v39 = vxor.u32 2147483648, %v222_v17  ;;  %v232_v57 = vsel %vm230_vm4, %v231_v44, %v222_v17  ;;  %v647_v60 = vsub.s32 %v643_v18, %v646_v55  ;;  %v282_v61 = vsel %vm268_vm5, %v279_v23, %v281_v45 }
 0x120   :  { %v284_v1 = vand.u32 65535, %v2040_v2  ;;  %v285_v54 = vshrl.u32 %v2040_v2, 16  ;;  %v286_v29 = vand.u32 65535, %v282_v61  ;;  %v287_v62 = vshrl.u32 %v282_v61, 16 }
 0x121   :  { %v229_v59 = vsel %vm227_vm6, %v214_v27, %v228_v39  ;;  %vm648_vm7 = vcmp.lt.s32.totalorder %v647_v60, 0  ;;  %v649_v63 = vsub.s32 0, %v647_v60  ;;  %v308_v41 = vand.u32 65535, %v278_v11 }
 0x122   :  { %v233_v53 = vsel %vm226_vm1, %v229_v59, %v232_v57  ;;  %v289_v10 = vmul.u32 %v287_v62, %v284_v1  ;;  %v290_v6 = vmul.u32 %v286_v29, %v285_v54  ;;  %v309_v12 = vshrl.u32 %v278_v11, 16  ;;  %v55_v59 = vpop.permute.xlu0 %54 }
 0x123   :  { %v234_v47 = vsel %vm223_vm14, nan, %v233_v53  ;;  %v650_v33 = vsel %vm648_vm7, %v649_v63, %v647_v60  ;;  %v288_v37 = vmul.u32 %v286_v29, %v284_v1  ;;  %v639_v43 = vadd.s32 %v1988_v5, %v1998_v13  ;;  %v1386_v53 = vld [vmem:[%s2339_s1] ss:$0 sm:$0xff] }
 0x124   :  { %1320 = vst [vmem:[#allocation2] sm:$0xff] %v234_v47  ;;  %v651_v19 = vclz %v650_v33  ;;  %v292_v50 = vshll.u32 %v289_v10, 16  ;;  %v271_v58 = vsel %vm267_vm2, %v251_v31, %v254_v21  ;;  %v291_v52 = vmul.u32 %v287_v62, %v285_v54 }
 0x125   :  { %v294_v20 = vshll.u32 %v290_v6, 16  ;;  %vm547_vm11 = vcmp.lt.s32.totalorder %v1842_v42, 0  ;;  %v669_v16 = vsub.s32 4, %v2026_v8  ;;  %v311_v0 = vmul.u32 %v309_v12, %v284_v1 }
 0x126   :  { %v1356_v25 = vadd.s32 4294967294, %v651_v19  ;;  %vm296_vm8 = vc.u32 %v288_v37, %v292_v50  ;;  %v298_v26 = vadd.s32 %v292_v50, %v288_v37  ;;  %v312_v56 = vmul.u32 %v308_v41, %v285_v54 }
 0x127   :  { %v297_v18 = vsel %vm296_vm8, 1, %v1413_v3  ;;  %v293_v27 = vshrl.u32 %v289_v10, 16  ;;  %v310_v21 = vmul.u32 %v308_v41, %v284_v1  ;;  %v314_v4 = vshll.u32 %v311_v0, 16 }
 0x128   :  { %vm1357_vm9 = vcmp.lt.s32.totalorder %v1356_v25, 0  ;;  %v299_v7 = vadd.s32 %v297_v18, %v291_v52  ;;  %vm300_vm10 = vc.u32 %v298_v26, %v294_v20  ;;  %v313_v14 = vmul.u32 %v309_v12, %v285_v54 }
 0x129   :  { %v654_v5 = vsel %vm1357_vm9, 0, %v1356_v25  ;;  %v301_v13 = vsel %vm300_vm10, 1, %v1413_v3  ;;  %v316_v51 = vshll.u32 %v312_v56, 16  ;;  %vm318_vm12 = vc.u32 %v310_v21, %v314_v4 }
 0x12a   :  { %v655_v15 = vsub.s32 32, %v654_v5  ;;  %v659_v17 = vsub.s32 4294967266, %v654_v5  ;;  %v303_v44 = vadd.s32 %v301_v13, %v299_v7  ;;  %v656_v23 = vshll.u32 %v647_v60, %v654_v5 }
 0x12b   :  { %v320_v39 = vadd.s32 %v314_v4, %v310_v21  ;;  %v319_v45 = vsel %vm318_vm12, 1, %v1413_v3  ;;  %v272_v61 = vsel %vm270_vm0, %v2018_v35, 2102212464  ;;  %v70_v60 = vmul.f32 %v1386_v53, %v60_v48 }
 0x12c   :  { %v657_v55 = vshrl.u32 %v639_v43, %v655_v15  ;;  %v660_v57 = vadd.s32 127, %v659_v17  ;;  %v304_v11 = vadd.s32 %v303_v44, %v293_v27  ;;  %v321_v1 = vadd.s32 %v319_v45, %v313_v14 }
 0x12d   :  { %vm322_vm15 = vc.u32 %v320_v39, %v316_v51  ;;  %v295_v62 = vshrl.u32 %v290_v6, 16  ;;  %v315_v63 = vshrl.u32 %v311_v0, 16  ;;  %v2077_v33 = vadd.f32 %v1839_v30, %v70_v60 }
 0x12e   :  { %v658_v54 = vor.u32 %v657_v55, %v656_v23  ;;  %v661_v29 = vshll.u32 %v660_v57, 23  ;;  %v323_v47 = vsel %vm322_vm15, 1, %v1413_v3  ;;  %v69_v31 = vmul.f32 %v1386_v53, %v55_v59 }
 0x12f   :  { %v325_v10 = vadd.s32 %v323_v47, %v321_v1  ;;  %v670_v35 = vsel %vm547_vm11, %v669_v16, %v2026_v8  ;;  %v273_v12 = vsel %vm269_vm3, %v2014_v22, %v272_v61  ;;  %v305_v19 = vadd.s32 %v304_v11, %v295_v62 }
 0x130   :  { %v662_v41 = vor.u32 4788187, %v661_v29  ;;  %v317_v37 = vshrl.u32 %v312_v56, 16  ;;  %v1165_v50 = vand.u32 2147483647, %v2077_v33  ;;  %v1168_v43 = vand.u32 2139095040, %v2077_v33 }
 0x131   :  { %v326_v6 = vadd.s32 %v325_v10, %v315_v63  ;;  %v665_v25 = vcvt.s32.f32 %v658_v54  ;;  %v324_v20 = vadd.s32 %v320_v39, %v316_v51  ;;  %v2088_v26 = vadd.f32 %v1839_v30, %v69_v31 }
 0x132   :  { %v663_v52 = vand.u32 2147483647, %v662_v41  ;;  %v274_v8 = vsel %vm268_vm5, %v271_v58, %v273_v12  ;;  %v1169_v18 = vshrl.u32 %v1168_v43, 23  ;;  %v1172_v22 = vand.u32 8388607, %v1165_v50 }
 0x133   :  { %v327_v16 = vadd.s32 %v326_v6, %v317_v37  ;;  %vm2096_vm13 = vcmp.le.f32.partialorder %v545_v46, 0.7853982  ;;  %vm330_vm14 = vc.u32 %v305_v19, %v324_v20  ;;  %v1013_v27 = vand.u32 2139095040, %v2088_v26 }
 0x134   :  { %v666_v56 = vmul.f32 %v665_v25, %v663_v52  ;;  %v672_v30 = vsel %vm2096_vm13, 0, %v670_v35  ;;  %v1367_v58 = vadd.s32 4294967169, %v1169_v18  ;;  %v1173_v7 = vor.u32 8388608, %v1172_v22 }
 0x135   :  { %v331_v24 = vadd.s32 1, %v327_v16  ;;  %v328_v13 = vmul.u32 %v2040_v2, %v274_v8  ;;  %v1014_v15 = vshrl.u32 %v1013_v27, 23  ;;  %v689_v17 = vadd.s32 3, %v672_v30 }
 0x136   :  { %v667_v5 = vxor.u32 2147483648, %v666_v56  ;;  %v1175_v4 = vadd.s32 1, %v1367_v58  ;;  %v2109_v48 = vshll.u32 %v1173_v7, 8  ;;  %vm237_vm1 = vcmp.lt.s32.totalorder %v1847_v9, 0 }
 0x137   :  { %v332_v21 = vsel %vm330_vm14, %v331_v24, %v327_v16  ;;  %v1364_v55 = vadd.s32 4294967169, %v1014_v15  ;;  %v2112_v45 = vand.u32 3, %v689_v17  ;;  %vm2116_vm2 = vcmp.le.f32.partialorder %v235_v28, 0.7853982 }
 0x138   :  { %v668_v46 = vsel %vm547_vm11, %v667_v5, %v666_v56  ;;  %v333_v44 = vadd.s32 %v332_v21, %v328_v13  ;;  %vm1176_vm0 = vcmp.gt.s32.totalorder %v1175_v4, 0  ;;  %v2120_v1 = vadd.s32 %v324_v20, %v305_v19 }
 0x139   :  { %v671_v14 = vsel %vm2096_vm13, %v1842_v42, %v668_v46  ;;  %v1177_v39 = vsel %vm1176_vm0, %v1175_v4, 0  ;;  %v2123_v60 = vand.u32 65535, %v2109_v48  ;;  %v1010_v54 = vand.u32 2147483647, %v2088_v26 }
 0x13a   :  { %v673_v23 = vmul.f32 %v671_v14, %v671_v14  ;;  %v334_v51 = vadd.s32 536870912, %v333_v44  ;;  %v1179_v2 = vand.u32 31, %v1177_v39  ;;  %v2127_v63 = vshrl.u32 %v2109_v48, 16 }
 0x13b   :  { %v2129_v31 = vshrl.u32 %v1177_v39, 5  ;;  %v2132_v41 = vadd.s32 1, %v1364_v55  ;;  %vm695_vm3 = vcmp.eq.s32.totalorder %v2112_v45, 2  ;;  %vm692_vm5 = vcmp.eq.s32.totalorder %v2112_v45, 0 }
 0x13c   :  { %v674_v57 = vmul.f32 -0.001358992, %v673_v23  ;;  %v681_v11 = vmul.f32 -0.00019511016, %v673_v23  ;;  %v335_v59 = vshrl.u32 %v334_v51, 30  ;;  %v1180_v53 = vsub.s32 32, %v1179_v2 }
 0x13d   :  { %v1182_v37 = vshll.u32 %v1414_v32, %v1179_v2  ;;  %v1185_v6 = vshll.u32 %v1415_v34, %v1179_v2  ;;  %v1188_v52 = vshll.u32 %v1416_v36, %v1179_v2  ;;  %vm691_vm6 = vcmp.lt.s32.totalorder %v2112_v45, 2 }
 0x13e   :  { %v675_v29 = vadd.f32 0.041655596, %v674_v57  ;;  %v682_v62 = vadd.f32 0.008332121, %v681_v11  ;;  %v336_v47 = vshll.u32 %v335_v59, 30  ;;  %v359_v10 = vsub.s32 4, %v335_v59 }
 0x13f   :  { %v1183_v28 = vshrl.u32 %v1415_v34, %v1180_v53  ;;  %v1186_v43 = vshrl.u32 %v1416_v36, %v1180_v53  ;;  %v1189_v25 = vshrl.u32 %v1417_v38, %v1180_v53  ;;  %v1181_v22 = vshrl.u32 %v1414_v32, %v1180_v53 }
 0x140   :  { %v676_v35 = vmul.f32 %v675_v29, %v673_v23  ;;  %v683_v12 = vmul.f32 %v682_v62, %v673_v23  ;;  %v2134_v19 = vsub.s32 %v333_v44, %v336_v47  ;;  %v360_v18 = vsel %vm237_vm1, %v359_v10, %v335_v59 }
 0x141   :  { %v1184_v0 = vor.u32 %v1183_v28, %v1182_v37  ;;  %v1192_v56 = vshrl.u32 %v1418_v40, %v1180_v53  ;;  %v1195_v58 = vshrl.u32 %v1419_v49, %v1180_v53  ;;  %vm688_vm7 = vweird.f32 %v1842_v42 }
 0x142   :  { %v677_v20 = vadd.f32 -0.4999988, %v676_v35  ;;  %v684_v8 = vadd.f32 -0.16666654, %v683_v12  ;;  %vm338_vm4 = vcmp.lt.s32.totalorder %v2134_v19, 0  ;;  %v339_v16 = vsub.s32 0, %v2134_v19 }
 0x143   :  { %v1190_v5 = vor.u32 %v1189_v25, %v1188_v52  ;;  %v1191_v13 = vshll.u32 %v1417_v38, %v1179_v2  ;;  %v1194_v21 = vshll.u32 %v1418_v40, %v1179_v2  ;;  %v362_v46 = vsel %vm2116_vm2, 0, %v360_v18 }
 0x144   :  { %v678_v27 = vmul.f32 %v677_v20, %v673_v23  ;;  %v685_v30 = vmul.f32 %v684_v8, %v673_v23  ;;  %v340_v24 = vsel %vm338_vm4, %v339_v16, %v2134_v19  ;;  %v1187_v17 = vor.u32 %v1186_v43, %v1185_v6 }
 0x145   :  { %v341_v7 = vclz %v340_v24  ;;  %v1193_v23 = vor.u32 %v1192_v56, %v1191_v13  ;;  %v1196_v51 = vor.u32 %v1195_v58, %v1194_v21  ;;  %vm1197_vm8 = vcmp.lt.s32.totalorder %v2129_v31, 1 }
 0x146   :  { %v679_v4 = vadd.f32 1.0, %v678_v27  ;;  %v686_v15 = vadd.f32 1.0, %v685_v30  ;;  %vm1198_vm11 = vcmp.lt.s32.totalorder %v2129_v31, 2  ;;  %vm1200_vm9 = vcmp.lt.s32.totalorder %v2129_v31, 4 }
 0x147   :  { %v1350_v44 = vadd.s32 4294967294, %v341_v7  ;;  %vm1199_vm12 = vcmp.lt.s32.totalorder %v2129_v31, 3  ;;  %v1201_v2 = vsel %vm1197_vm8, %v1181_v22, %v1184_v0  ;;  %v1202_v57 = vsel %vm1200_vm9, %v1190_v5, 2102212464 }
 0x148   :  { %v687_v39 = vmul.f32 %v686_v15, %v671_v14  ;;  %v696_v55 = vxor.u32 2147483648, %v679_v4  ;;  %v1205_v14 = vsel %vm1197_vm8, %v1184_v0, %v1187_v17  ;;  %v1203_v10 = vsel %vm1199_vm12, %v1187_v17, %v1202_v57 }
 0x149   :  { %vm1351_vm10 = vcmp.lt.s32.totalorder %v1350_v44, 0  ;;  %v1206_v35 = vsel %vm1200_vm9, %v1193_v23, 920167782  ;;  %v1209_v12 = vsel %vm1197_vm8, %v1187_v17, %v1190_v5  ;;  %v1210_v37 = vsel %vm1200_vm9, %v1196_v51, 1326507024 }
 0x14a   :  { %v693_v11 = vxor.u32 2147483648, %v687_v39  ;;  %v697_v59 = vsel %vm695_vm3, %v696_v55, %v687_v39  ;;  %v344_v53 = vsel %vm1351_vm10, 0, %v1350_v44  ;;  %v1207_v52 = vsel %vm1199_vm12, %v1190_v5, %v1206_v35 }
 0x14b   :  { %v345_v29 = vsub.s32 32, %v344_v53  ;;  %v346_v62 = vshll.u32 %v2134_v19, %v344_v53  ;;  %v349_v47 = vsub.s32 4294967266, %v344_v53  ;;  %v2189_v20 = vsel %vm1198_vm11, %v1201_v2, %v1203_v10 }
 0x14c   :  { %v694_v28 = vsel %vm692_vm5, %v679_v4, %v693_v11  ;;  %v1208_v8 = vsel %vm1198_vm11, %v1205_v14, %v1207_v52  ;;  %v1211_v45 = vsel %vm1199_vm12, %v1193_v23, %v1210_v37  ;;  %vm1021_vm15 = vcmp.gt.s32.totalorder %v2132_v41, 0 }
 0x14d   :  { %v698_v6 = vsel %vm691_vm6, %v694_v28, %v697_v59  ;;  %v347_v19 = vshrl.u32 %v2120_v1, %v345_v29  ;;  %v350_v43 = vadd.s32 127, %v349_v47  ;;  %v1212_v18 = vsel %vm1198_vm11, %v1209_v12, %v1211_v45 }
 0x14e   :  { %v699_v25 = vsel %vm688_vm7, nan, %v698_v6  ;;  %v1238_v22 = vand.u32 65535, %v1208_v8  ;;  %v1216_v0 = vand.u32 65535, %v1212_v18  ;;  %v1217_v42 = vshrl.u32 %v1212_v18, 16 }
 0x14f   :  { %1323 = vst [vmem:[#allocation2 + $0x18] sm:$0xff] %v699_v25  ;;  %v348_v16 = vor.u32 %v347_v19, %v346_v62  ;;  %v351_v1 = vshll.u32 %v350_v43, 23  ;;  %v1239_v56 = vshrl.u32 %v1208_v8, 16  ;;  %v2201_v24 = vand.u32 8388607, %v1010_v54 }
 0x150   :  { %v1242_v30 = vmul.u32 %v1238_v22, %v2127_v63  ;;  %v2203_v58 = vadd.s32 3, %v362_v46  ;;  %v1219_v7 = vmul.u32 %v1217_v42, %v2123_v60  ;;  %v1220_v31 = vmul.u32 %v1216_v0, %v2127_v63 }
 0x151   :  { %v352_v27 = vor.u32 4788187, %v351_v1  ;;  %v1258_v5 = vmul.u32 %v2109_v48, %v2189_v20  ;;  %v355_v21 = vcvt.s32.f32 %v348_v16  ;;  %v1241_v4 = vmul.u32 %v1239_v56, %v2123_v60 }
 0x152   :  { %v1022_v15 = vsel %vm1021_vm15, %v2132_v41, 0  ;;  %v1218_v17 = vmul.u32 %v1216_v0, %v2123_v60  ;;  %v1221_v44 = vmul.u32 %v1217_v42, %v2127_v63  ;;  %v1222_v23 = vshll.u32 %v1219_v7, 16 }
 0x153   :  { %v353_v13 = vand.u32 2147483647, %v352_v27  ;;  %v1240_v46 = vmul.u32 %v1238_v22, %v2123_v60  ;;  %v1243_v39 = vmul.u32 %v1239_v56, %v2127_v63  ;;  %v1244_v55 = vshll.u32 %v1241_v4, 16 }
 0x154   :  { %v1246_v2 = vshll.u32 %v1242_v30, 16  ;;  %v1224_v57 = vshll.u32 %v1220_v31, 16  ;;  %vm1226_vm13 = vc.u32 %v1218_v17, %v1222_v23  ;;  %v1228_v11 = vadd.s32 %v1222_v23, %v1218_v17 }
 0x155   :  { %v356_v51 = vmul.f32 %v355_v21, %v353_v13  ;;  %v1024_v59 = vand.u32 31, %v1022_v15  ;;  %v1227_v14 = vsel %vm1226_vm13, 1, %v1413_v3  ;;  %vm1248_vm14 = vc.u32 %v1240_v46, %v1244_v55 }
 0x156   :  { %v1250_v41 = vadd.s32 %v1244_v55, %v1240_v46  ;;  %v1229_v29 = vadd.s32 %v1227_v14, %v1221_v44  ;;  %vm1230_vm0 = vc.u32 %v1228_v11, %v1224_v57  ;;  %v1249_v62 = vsel %vm1248_vm14, 1, %v1413_v3 }
 0x157   :  { %v357_v53 = vxor.u32 2147483648, %v356_v51  ;;  %v2217_v47 = vsub.s32 32, %v1024_v59  ;;  %v1231_v63 = vsel %vm1230_vm0, 1, %v1413_v3  ;;  %v1251_v10 = vadd.s32 %v1249_v62, %v1243_v39 }
 0x158   :  { %vm1252_vm3 = vc.u32 %v1250_v41, %v1246_v2  ;;  %v1223_v35 = vshrl.u32 %v1219_v7, 16  ;;  %v1233_v12 = vadd.s32 %v1231_v63, %v1229_v29  ;;  %v1225_v19 = vshrl.u32 %v1220_v31, 16 }
 0x159   :  { %v358_v60 = vsel %vm237_vm1, %v357_v53, %v356_v51  ;;  %v1253_v37 = vsel %vm1252_vm3, 1, %v1413_v3  ;;  %v1245_v43 = vshrl.u32 %v1241_v4, 16  ;;  %v1247_v8 = vshrl.u32 %v1242_v30, 16 }
 0x15a   :  { %v361_v28 = vsel %vm2116_vm2, %v1847_v9, %v358_v60  ;;  %v1255_v52 = vadd.s32 %v1253_v37, %v1251_v10  ;;  %v1234_v25 = vadd.s32 %v1233_v12, %v1223_v35  ;;  %v2226_v45 = vadd.s32 %v1250_v41, %v1246_v2 }
 0x15b   :  { %v363_v6 = vmul.f32 %v361_v28, %v361_v28  ;;  %v2228_v16 = vshrl.u32 %v1022_v15, 5  ;;  %v1028_v61 = vshrl.u32 %v1415_v34, %v2217_v47  ;;  %v1027_v42 = vshll.u32 %v1414_v32, %v1024_v59 }
 0x15c   :  { %v1256_v22 = vadd.s32 %v1255_v52, %v1245_v43  ;;  %v2232_v0 = vadd.s32 %v1234_v25, %v1225_v19  ;;  %v1030_v56 = vshll.u32 %v1415_v34, %v1024_v59  ;;  %v1031_v27 = vshrl.u32 %v1416_v36, %v2217_v47 }
 0x15d   :  { %v364_v1 = vmul.f32 -0.001358992, %v363_v6  ;;  %v371_v18 = vmul.f32 -0.00019511016, %v363_v6  ;;  %v1034_v13 = vshrl.u32 %v1417_v38, %v2217_v47  ;;  %v1033_v21 = vshll.u32 %v1416_v36, %v1024_v59 }
 0x15e   :  { %v1257_v31 = vadd.s32 %v1256_v22, %v1247_v8  ;;  %vm1260_vm1 = vc.u32 %v2232_v0, %v2226_v45  ;;  %v1036_v4 = vshll.u32 %v1417_v38, %v1024_v59  ;;  %v1037_v15 = vshrl.u32 %v1418_v40, %v2217_v47 }
 0x15f   :  { %v365_v30 = vadd.f32 0.041655596, %v364_v1  ;;  %v372_v7 = vadd.f32 0.008332121, %v371_v18  ;;  %v2246_v23 = vor.u32 %v1028_v61, %v1027_v42  ;;  %v2248_v46 = vor.u32 %v1031_v27, %v1030_v56 }
 0x160   :  { %v1261_v44 = vadd.s32 1, %v1257_v31  ;;  %v1038_v51 = vor.u32 %v1037_v15, %v1036_v4  ;;  %v1039_v39 = vshll.u32 %v1418_v40, %v1024_v59  ;;  %v1040_v55 = vshrl.u32 %v1419_v49, %v2217_v47 }
 0x161   :  { %v366_v34 = vmul.f32 %v365_v30, %v363_v6  ;;  %v373_v17 = vmul.f32 %v372_v7, %v363_v6  ;;  %v2253_v38 = vor.u32 %v1034_v13, %v1033_v21  ;;  %v380_v11 = vand.u32 3, %v2203_v58 }
 0x162   :  { %v1262_v57 = vsel %vm1260_vm1, %v1261_v44, %v1257_v31  ;;  %v1018_v14 = vor.u32 8388608, %v2201_v24  ;;  %v1041_v41 = vor.u32 %v1040_v55, %v1039_v39  ;;  %vm1042_vm2 = vcmp.lt.s32.totalorder %v2228_v16, 1 }
 0x163   :  { %v367_v2 = vadd.f32 -0.4999988, %v366_v34  ;;  %v374_v36 = vadd.f32 -0.16666654, %v373_v17  ;;  %v1263_v53 = vadd.s32 %v1262_v57, %v1258_v5  ;;  %vm1045_vm4 = vcmp.lt.s32.totalorder %v2228_v16, 4 }
 0x164   :  { %vm1044_vm5 = vcmp.lt.s32.totalorder %v2228_v16, 3  ;;  %v1050_v49 = vsel %vm1042_vm2, %v2246_v23, %v2248_v46  ;;  %v1051_v48 = vsel %vm1045_vm4, %v1038_v51, 920167782  ;;  %v1054_v5 = vsel %vm1042_vm2, %v2248_v46, %v2253_v38 }
 0x165   :  { %v368_v29 = vmul.f32 %v367_v2, %v363_v6  ;;  %v375_v62 = vmul.f32 %v374_v36, %v363_v6  ;;  %v1264_v40 = vadd.s32 536870912, %v1263_v53  ;;  %v1052_v58 = vsel %vm1044_vm5, %v2253_v38, %v1051_v48 }
 0x166   :  { %v1055_v60 = vsel %vm1045_vm4, %v1041_v41, 1326507024  ;;  %v2280_v63 = vshll.u32 %v1018_v14, 8  ;;  %vm1043_vm6 = vcmp.lt.s32.totalorder %v2228_v16, 2  ;;  %vm378_vm7 = vweird.f32 %v1847_v9 }
 0x167   :  { %v369_v20 = vadd.f32 1.0, %v368_v29  ;;  %v376_v24 = vadd.f32 1.0, %v375_v62  ;;  %v2276_v59 = vshrl.u32 %v1264_v40, 30  ;;  %v1056_v12 = vsel %vm1044_vm5, %v1038_v51, %v1055_v60 }
 0x168   :  { %v1053_v6 = vsel %vm1043_vm6, %v1050_v49, %v1052_v58  ;;  %v1057_v19 = vsel %vm1043_vm6, %v1054_v5, %v1056_v12  ;;  %vm381_vm8 = vcmp.lt.s32.totalorder %v380_v11, 2  ;;  %vm382_vm11 = vcmp.eq.s32.totalorder %v380_v11, 0 }
 0x169   :  { %v377_v10 = vmul.f32 %v376_v24, %v361_v28  ;;  %v386_v35 = vxor.u32 2147483648, %v369_v20  ;;  %v1266_v37 = vshll.u32 %v2276_v59, 30  ;;  %v1061_v28 = vand.u32 65535, %v1057_v19 }
 0x16a   :  { %vm385_vm9 = vcmp.eq.s32.totalorder %v380_v11, 2  ;;  %v1059_v25 = vand.u32 65535, %v2280_v63  ;;  %v1062_v8 = vshrl.u32 %v1057_v19, 16  ;;  %v1060_v22 = vshrl.u32 %v2280_v63, 16 }
 0x16b   :  { %v383_v43 = vxor.u32 2147483648, %v377_v10  ;;  %v1267_v52 = vsub.s32 %v1263_v53, %v1266_v37  ;;  %v387_v18 = vsel %vm385_vm9, %v386_v35, %v377_v10  ;;  %v1084_v61 = vshrl.u32 %v1053_v6, 16 }
 0x16c   :  { %v1083_v27 = vand.u32 65535, %v1053_v6  ;;  %v1064_v7 = vmul.u32 %v1062_v8, %v1059_v25  ;;  %v1065_v31 = vmul.u32 %v1061_v28, %v1060_v22  ;;  %v1063_v4 = vmul.u32 %v1061_v28, %v1059_v25 }
 0x16d   :  { %v384_v1 = vsel %vm382_vm11, %v369_v20, %v383_v43  ;;  %vm1268_vm10 = vcmp.lt.s32.totalorder %v1267_v52, 0  ;;  %v1269_v56 = vsub.s32 0, %v1267_v52  ;;  %v1086_v34 = vmul.u32 %v1084_v61, %v1059_v25 }
 0x16e   :  { %v388_v42 = vsel %vm381_vm8, %v384_v1, %v387_v18  ;;  %v1067_v15 = vshll.u32 %v1064_v7, 16  ;;  %v1259_v17 = vadd.s32 %v2226_v45, %v2232_v0  ;;  %v1066_v44 = vmul.u32 %v1062_v8, %v1060_v22 }
 0x16f   :  { %v389_v30 = vsel %vm378_vm7, nan, %v388_v42  ;;  %v1270_v13 = vsel %vm1268_vm10, %v1269_v56, %v1267_v52  ;;  %v1087_v51 = vmul.u32 %v1083_v27, %v1060_v22  ;;  %v1069_v55 = vshll.u32 %v1065_v31, 16 }
 0x170   :  { %1321 = vst [vmem:[#allocation2 + $0x8] sm:$0xff] %v389_v30  ;;  %v1271_v21 = vclz %v1270_v13  ;;  %vm1071_vm12 = vc.u32 %v1063_v4, %v1067_v15  ;;  %v1073_v2 = vadd.s32 %v1067_v15, %v1063_v4  ;;  %v1068_v36 = vshrl.u32 %v1064_v7, 16 }
 0x171   :  { %v1072_v9 = vsel %vm1071_vm12, 1, %v1413_v3  ;;  %v1085_v57 = vmul.u32 %v1083_v27, %v1059_v25  ;;  %v1089_v11 = vshll.u32 %v1086_v34, 16  ;;  %v1091_v14 = vshll.u32 %v1087_v51, 16 }
 0x172   :  { %v1368_v39 = vadd.s32 4294967294, %v1271_v21  ;;  %v1074_v53 = vadd.s32 %v1072_v9, %v1066_v44  ;;  %vm1075_vm13 = vc.u32 %v1073_v2, %v1069_v55  ;;  %v1088_v49 = vmul.u32 %v1084_v61, %v1060_v22 }
 0x173   :  { %v1076_v29 = vsel %vm1075_vm13, 1, %v1413_v3  ;;  %vm1093_vm14 = vc.u32 %v1085_v57, %v1089_v11  ;;  %v1095_v45 = vadd.s32 %v1089_v11, %v1085_v57  ;;  %v1047_v20 = vsel %vm1045_vm4, %v2253_v38, 2102212464 }
 0x174   :  { %vm1369_vm15 = vcmp.lt.s32.totalorder %v1368_v39, 0  ;;  %v1078_v40 = vadd.s32 %v1076_v29, %v1074_v53  ;;  %v1094_v24 = vsel %vm1093_vm14, 1, %v1413_v3  ;;  %v1026_v35 = vshrl.u32 %v1414_v32, %v2217_v47 }
 0x175   :  { %v1274_v41 = vsel %vm1369_vm15, 0, %v1368_v39  ;;  %vm1097_vm0 = vc.u32 %v1095_v45, %v1091_v14  ;;  %v1096_v10 = vadd.s32 %v1094_v24, %v1088_v49  ;;  %v1070_v12 = vshrl.u32 %v1065_v31, 16 }
 0x176   :  { %v1275_v0 = vsub.s32 32, %v1274_v41  ;;  %v1279_v62 = vsub.s32 4294967266, %v1274_v41  ;;  %v1276_v48 = vshll.u32 %v1267_v52, %v1274_v41  ;;  %v1079_v60 = vadd.s32 %v1078_v40, %v1068_v36 }
 0x177   :  { %v1098_v37 = vsel %vm1097_vm0, 1, %v1413_v3  ;;  %v1090_v43 = vshrl.u32 %v1086_v34, 16  ;;  %v1046_v38 = vsel %vm1042_vm2, %v1026_v35, %v2246_v23  ;;  %v1048_v52 = vsel %vm1044_vm5, %v2248_v46, %v1047_v20 }
 0x178   :  { %v1277_v58 = vshrl.u32 %v1259_v17, %v1275_v0  ;;  %v1280_v5 = vadd.s32 127, %v1279_v62  ;;  %v1100_v28 = vadd.s32 %v1098_v37, %v1096_v10  ;;  %v1080_v25 = vadd.s32 %v1079_v60, %v1070_v12 }
 0x179   :  { %v1092_v1 = vshrl.u32 %v1087_v51, 16  ;;  %v1099_v32 = vadd.s32 %v1095_v45, %v1091_v14  ;;  %v1049_v3 = vsel %vm1043_vm6, %v1046_v38, %v1048_v52  ;;  %vm1167_vm1 = vcmp.lt.s32.totalorder %v2077_v33, 0 }
 0x17a   :  { %v1278_v6 = vor.u32 %v1277_v58, %v1276_v48  ;;  %v1281_v19 = vshll.u32 %v1280_v5, 23  ;;  %v1101_v18 = vadd.s32 %v1100_v28, %v1090_v43  ;;  %v1103_v23 = vmul.u32 %v2280_v63, %v1049_v3 }
 0x17b   :  { %vm1105_vm3 = vc.u32 %v1080_v25, %v1099_v32  ;;  %vm2318_vm2 = vcmp.le.f32.partialorder %v1165_v50, 0.7853982  ;;  %v1289_v16 = vsub.s32 4, %v2276_v59  ;;  %v1104_v58 = vadd.s32 %v1099_v32, %v1080_v25 }
 0x17c   :  { %v1282_v8 = vor.u32 4788187, %v1281_v19  ;;  %v1285_v22 = vcvt.s32.f32 %v1278_v6  ;;  %v1102_v61 = vadd.s32 %v1101_v18, %v1092_v1  ;;  %vm1308_vm11 = vweird.f32 %v2077_v33 }
 0x17d   :  { %v1290_v17 = vsel %vm1167_vm1, %v1289_v16, %v2276_v59  ;;  %vm1012_vm9 = vcmp.lt.s32.totalorder %v2088_v26, 0  ;;  %vm1011_vm10 = vcmp.le.f32.partialorder %v1010_v54, 0.7853982  ;;  %vm1153_vm14 = vweird.f32 %v2088_v26 }
 0x17e   :  { %v1283_v47 = vand.u32 2147483647, %v1282_v8  ;;  %v1106_v56 = vadd.s32 1, %v1102_v61  ;;  %v1292_v55 = vsel %vm2318_vm2, 0, %v1290_v17 }
 0x17f   :  { %v1309_v53 = vadd.s32 3, %v1292_v55 }
 0x180   :  { %v1286_v42 = vmul.f32 %v1285_v22, %v1283_v47  ;;  %v1107_v30 = vsel %vm1105_vm3, %v1106_v56, %v1102_v61 }
 0x181   :  { %v1108_v46 = vadd.s32 %v1107_v30, %v1103_v23  ;;  %v1310_v40 = vand.u32 3, %v1309_v53 }
 0x182   :  { %v1287_v27 = vxor.u32 2147483648, %v1286_v42 }
 0x183   :  { %v1109_v21 = vadd.s32 536870912, %v1108_v46  ;;  %vm1312_vm6 = vcmp.eq.s32.totalorder %v1310_v40, 0  ;;  %vm1315_vm7 = vcmp.eq.s32.totalorder %v1310_v40, 2  ;;  %vm1311_vm8 = vcmp.lt.s32.totalorder %v1310_v40, 2 }
 0x184   :  { %v1288_v31 = vsel %vm1167_vm1, %v1287_v27, %v1286_v42 }
 0x185   :  { %v1291_v13 = vsel %vm2318_vm2, %v2077_v33, %v1288_v31  ;;  %v1110_v4 = vshrl.u32 %v1109_v21, 30 }
 0x186   :  { %v1293_v63 = vmul.f32 %v1291_v13, %v1291_v13 }
 0x187   :  { %v1111_v44 = vshll.u32 %v1110_v4, 30  ;;  %v1134_v47 = vsub.s32 4, %v1110_v4 }
 0x188   :  { %v1294_v15 = vmul.f32 -0.001358992, %v1293_v63  ;;  %v1301_v34 = vmul.f32 -0.00019511016, %v1293_v63 }
 0x189   :  { %v1112_v39 = vsub.s32 %v1108_v46, %v1111_v44  ;;  %v1135_v42 = vsel %vm1012_vm9, %v1134_v47, %v1110_v4 }
 0x18a   :  { %v1295_v51 = vadd.f32 0.041655596, %v1294_v15  ;;  %v1302_v50 = vadd.f32 0.008332121, %v1301_v34  ;;  %v1137_v27 = vsel %vm1011_vm10, 0, %v1135_v42 }
 0x18b   :  { %vm1113_vm4 = vcmp.lt.s32.totalorder %v1112_v39, 0  ;;  %v1114_v9 = vsub.s32 0, %v1112_v39  ;;  %v1154_v16 = vadd.s32 3, %v1137_v27 }
 0x18c   :  { %v1296_v2 = vmul.f32 %v1295_v51, %v1293_v63  ;;  %v1303_v36 = vmul.f32 %v1302_v50, %v1293_v63 }
 0x18d   :  { %v1115_v14 = vsel %vm1113_vm4, %v1114_v9, %v1112_v39  ;;  %v1155_v15 = vand.u32 3, %v1154_v16 }
 0x18e   :  { %v1297_v57 = vadd.f32 -0.4999988, %v1296_v2  ;;  %v1304_v11 = vadd.f32 -0.16666654, %v1303_v36  ;;  %v1116_v45 = vclz %v1115_v14 }
 0x18f   :  { %vm1157_vm12 = vcmp.eq.s32.totalorder %v1155_v15, 0  ;;  %vm1160_vm15 = vcmp.eq.s32.totalorder %v1155_v15, 2  ;;  %vm1156_vm13 = vcmp.lt.s32.totalorder %v1155_v15, 2 }
 0x190   :  { %v1298_v41 = vmul.f32 %v1297_v57, %v1293_v63  ;;  %v1305_v29 = vmul.f32 %v1304_v11, %v1293_v63  ;;  %v1365_v62 = vadd.s32 4294967294, %v1116_v45 }
 0x192   :  { %v1299_v0 = vadd.f32 1.0, %v1298_v41  ;;  %v1306_v59 = vadd.f32 1.0, %v1305_v29  ;;  %vm1366_vm5 = vcmp.lt.s32.totalorder %v1365_v62, 0 }
 0x193   :  { %v1119_v20 = vsel %vm1366_vm5, 0, %v1365_v62 }
 0x194   :  { %v1307_v49 = vmul.f32 %v1306_v59, %v1291_v13  ;;  %v1316_v48 = vxor.u32 2147483648, %v1299_v0  ;;  %v1120_v5 = vsub.s32 32, %v1119_v20  ;;  %v1124_v60 = vsub.s32 4294967266, %v1119_v20 }
 0x195   :  { %v1121_v6 = vshll.u32 %v1112_v39, %v1119_v20 }
 0x196   :  { %v1313_v24 = vxor.u32 2147483648, %v1307_v49  ;;  %v1317_v35 = vsel %vm1315_vm7, %v1316_v48, %v1307_v49  ;;  %v1122_v12 = vshrl.u32 %v1104_v58, %v1120_v5  ;;  %v1125_v19 = vadd.s32 127, %v1124_v60 }
 0x198   :  { %v1314_v10 = vsel %vm1312_vm6, %v1299_v0, %v1313_v24  ;;  %v1123_v28 = vor.u32 %v1122_v12, %v1121_v6  ;;  %v1126_v38 = vshll.u32 %v1125_v19, 23 }
 0x199   :  { %v1318_v37 = vsel %vm1311_vm8, %v1314_v10, %v1317_v35 }
 0x19a   :  { %v1319_v43 = vsel %vm1308_vm11, nan, %v1318_v37  ;;  %v1127_v52 = vor.u32 4788187, %v1126_v38  ;;  %v1130_v25 = vcvt.s32.f32 %v1123_v28 }
 0x19b   :  { %1327 = vst [vmem:[#allocation2 + $0x38] sm:$0xff] %v1319_v43 }
 0x19c   :  { %v1128_v8 = vand.u32 2147483647, %v1127_v52 }
 0x19e   :  { %v1131_v1 = vmul.f32 %v1130_v25, %v1128_v8 }
 0x1a0   :  { %v1132_v18 = vxor.u32 2147483648, %v1131_v1 }
 0x1a2   :  { %v1133_v32 = vsel %vm1012_vm9, %v1132_v18, %v1131_v1 }
 0x1a3   :  { %v1136_v33 = vsel %vm1011_vm10, %v2088_v26, %v1133_v32 }
 0x1a4   :  { %v1138_v22 = vmul.f32 %v1136_v33, %v1136_v33 }
 0x1a6   :  { %v1139_v3 = vmul.f32 -0.001358992, %v1138_v22  ;;  %v1146_v61 = vmul.f32 -0.00019511016, %v1138_v22 }
 0x1a8   :  { %v1140_v56 = vadd.f32 0.041655596, %v1139_v3  ;;  %v1147_v23 = vadd.f32 0.008332121, %v1146_v61 }
 0x1aa   :  { %v1141_v30 = vmul.f32 %v1140_v56, %v1138_v22  ;;  %v1148_v46 = vmul.f32 %v1147_v23, %v1138_v22 }
 0x1ac   :  { %v1142_v7 = vadd.f32 -0.4999988, %v1141_v30  ;;  %v1149_v31 = vadd.f32 -0.16666654, %v1148_v46 }
 0x1ae   :  { %v1143_v13 = vmul.f32 %v1142_v7, %v1138_v22  ;;  %v1150_v21 = vmul.f32 %v1149_v31, %v1138_v22 }
 0x1b0   :  { %v1144_v63 = vadd.f32 1.0, %v1143_v13  ;;  %v1151_v54 = vadd.f32 1.0, %v1150_v21 }
 0x1b2   :  { %v1152_v34 = vmul.f32 %v1151_v54, %v1136_v33  ;;  %v1161_v17 = vxor.u32 2147483648, %v1144_v63 }
 0x1b4   :  { %v1158_v4 = vxor.u32 2147483648, %v1152_v34  ;;  %v1162_v51 = vsel %vm1160_vm15, %v1161_v17, %v1152_v34 }
 0x1b6   :  { %v1159_v44 = vsel %vm1157_vm12, %v1144_v63, %v1158_v4 }
 0x1b7   :  { %v1163_v50 = vsel %vm1156_vm13, %v1159_v44, %v1162_v51 }
 0x1b8   :  { %v1164_v39 = vsel %vm1153_vm14, nan, %v1163_v50 }
 0x1b9   :  { %1326 = vst [vmem:[#allocation2 + $0x30] sm:$0xff] %v1164_v39 }
 0x1ba   :  { %1340 = dma.vmem_to_hbm [thread:$0]  %s1333_s7, 1024, %s1335_s5, [#allocation3], %s1421_s8, %s1421_s8, %s1422_s9  }
 0x1bb   :  { %1411 = dma.done.wait [#allocation3], 1024  }
 0x1bc   :  { %1412 = vsyncadd [#allocation3], 4294966272 }
 0x1bd   :  { %1345 = vsyncpa [#allocation3], 1 }

</bundles_post_ra>
